<compile_context>
chip_gen: v6e
topology: v6e:2x2x1
jax: 0.10.0
libtpu: 0.0.40
codegen_flags: <defaults>
</compile_context>

<pallas_src>
import functools
import math

import numpy as np
import jax
import jax.numpy as jnp
from jax.experimental import pallas as pl
from jax.experimental.pallas import tpu as pltpu

# PyTorch BatchNorm (eval mode, default stats: mean=0, var=1, gamma=1, beta=0)
# reduces to a per-channel scale of 1/sqrt(1 + eps), folded into conv weights.
# TODO(synk): for trained checkpoints fold per-channel gamma/sqrt(var+eps) and
#             beta - gamma*mean/sqrt(var+eps) instead of this constant.
BN_SCALE = 1.0 / math.sqrt(1.0 + 1e-5)


def _round_up(x, m):
    return ((x + m - 1) // m) * m


def _tap_geometry(H, W):
    """Static per-tap lane shifts and validity masks for a 3x3 / pad-1 conv on a
    channel-major (C, H*W) activation."""
    S = H * W
    shifts = []
    masks = np.zeros((9, S), np.float32)
    r = np.arange(S) // W
    c = np.arange(S) % W
    for k in range(9):
        kh, kw = divmod(k, 3)
        dh, dw = kh - 1, kw - 1
        d = dh * W + dw                          # source index = s + d
        shifts.append((-d) % S)
        valid = (r + dh >= 0) & (r + dh < H) & (c + dw >= 0) & (c + dw < W)
        masks[k] = valid.astype(np.float32)
    return tuple(shifts), jnp.asarray(masks)


def _stride2_selector(H, W):
    """0/1 matrix picking the stride-2 positions out of the full-resolution conv
    output (the in-kernel 'gather' is a single exact f32 MXU dot)."""
    Ho = (H - 1) // 2 + 1
    Wo = (W - 1) // 2 + 1
    S, So = H * W, Ho * Wo
    sel = np.zeros((S, So), np.float32)
    for i in range(Ho):
        for j in range(Wo):
            sel[(2 * i) * W + (2 * j), i * Wo + j] = 1.0
    return jnp.asarray(sel), Ho, Wo


# ---------------------------------------------------------------------------
# Fused BasicBlock + AttentionModule + Downsample kernel (one step per batch)
# ---------------------------------------------------------------------------
def _res_block_kernel(shifts, Cout, has_proj,
                      x_ref, mask_ref, tapm_ref, sel_ref,
                      w1_ref, b1_ref, w2_ref, b2_ref, ws_ref, bs_ref,
                      wqkv_ref, wo_ref, wd_ref, bd_ref,
                      res_ref, down_ref):
    """conv3x3-BN-ReLU -> conv3x3-BN -> (+shortcut, ReLU) -> single-head SDPA
    with additive mask and residual -> 3x3/s2 downsample conv, all in VMEM.

    Everything is channel-major (C, S): channels on sublanes, S lane-dense.
    """

    def conv_slab(v):                        # (C, S) f32 -> (9*C, S) bf16 slab
        pieces = []
        for k, sh in enumerate(shifts):
            if sh == 0:                      # centre tap: untouched activation
                pieces.append(v)
            else:
                pieces.append(pltpu.roll(v, sh, axis=1) * tapm_ref[k:k + 1, :])
        return jnp.concatenate(pieces, axis=0).astype(jnp.bfloat16)

    xf = x_ref[...].astype(jnp.float32)      # (Cin_p, S)

    # ---- conv1 (3x3/s1/p1) + folded BN + ReLU: one K=9*Cin dot --------------
    h1 = jnp.dot(w1_ref[...], conv_slab(xf),
                 preferred_element_type=jnp.float32) + b1_ref[...]
    h1 = jnp.maximum(h1, 0.0)                # (Cout, S)

    # ---- conv2 (3x3/s1/p1) + folded BN: one K=9*Cout dot --------------------
    h2 = jnp.dot(w2_ref[...], conv_slab(h1),
                 preferred_element_type=jnp.float32) + b2_ref[...]

    # ---- shortcut + fused residual add + ReLU (BasicBlock epilogue) ---------
    # TODO(synk): BasicBlock source not provided; standard ResNet basic block
    #             assumed (1x1 conv + BN projection shortcut when Cin != Cout).
    if has_proj:
        sc = jnp.dot(ws_ref[...], x_ref[...],
                     preferred_element_type=jnp.float32) + bs_ref[...]
    else:
        sc = xf[0:Cout, :]
    r = jnp.maximum(h2 + sc, 0.0)            # (Cout, S) f32

    # ---- attention: fused QKV, SDPA + additive mask, out-proj, residual -----
    # TODO(synk): AttentionModule(1) source not provided; single-head scaled
    #             dot-product spatial self-attention with residual assumed.
    # TODO(synk): for large S (v7x 64 MiB VMEM) switch to a KV-tiled
    #             flash-style online softmax instead of the full (S, S) block.
    r_b = r.astype(jnp.bfloat16)
    qkv = jnp.dot(wqkv_ref[...], r_b,
                  preferred_element_type=jnp.float32)       # (3C, S)
    q = qkv[0:Cout, :]                                      # sublane-aligned
    kx = qkv[Cout:2 * Cout, :].astype(jnp.bfloat16)         # slices (8 rows)
    v = qkv[2 * Cout:3 * Cout, :].astype(jnp.bfloat16)
    s = jnp.dot(q.T.astype(jnp.bfloat16), kx,
                preferred_element_type=jnp.float32)          # (S, S)
    s = s + mask_ref[...].astype(jnp.float32)
    m = jnp.max(s, axis=-1, keepdims=True)
    p = jnp.exp(s - m)
    p = p / jnp.sum(p, axis=-1, keepdims=True)               # exact softmax
    pv = jax.lax.dot_general(v, p.astype(jnp.bfloat16),
                             (((1,), (1,)), ((), ())),
                             preferred_element_type=jnp.float32)  # (C, S)
    o = jnp.dot(wo_ref[...], pv.astype(jnp.bfloat16),
                preferred_element_type=jnp.float32)
    res = r + o
    res_ref[...] = res.astype(res_ref.dtype)                  # lane-dense store

    # ---- fused Downsample: 3x3 / stride-2 / pad-1 conv + bias ---------------
    # TODO(synk): Downsample source not provided; 3x3/s2/p1 conv + bias assumed.
    fd = jnp.dot(wd_ref[...], conv_slab(res),
                 preferred_element_type=jnp.float32)           # (Cout, S)
    down = jnp.dot(fd, sel_ref[...],
                   preferred_element_type=jnp.float32) + bd_ref[...]
    down_ref[...] = down.astype(down_ref.dtype)


def _fused_res_block(x_tok, mask_bf16, prep):
    N, cin_p, S = x_tok.shape
    Cout = prep["cout"]
    So = prep["so"]
    kernel = functools.partial(_res_block_kernel, prep["shifts"], Cout,
                               prep["has_proj"])
    return pl.pallas_call(
        kernel,
        out_shape=(jax.ShapeDtypeStruct((N, Cout, S), jnp.float32),
                   jax.ShapeDtypeStruct((N, Cout, So), jnp.float32)),
        # TODO(synk): for small/odd N on v7x, add a second parallel grid axis
        #             (query-row tiles of S) so both TensorCores stay busy.
        grid=(N,),
        in_specs=[
            pl.BlockSpec((None, cin_p, S), lambda b: (b, 0, 0)),
            # NOTE: if the mask is batch-invariant, pass a single (S, S) mask
            #       with index_map lambda b: (0, 0) to skip the per-step copy.
            pl.BlockSpec((None, S, S), lambda b: (b, 0, 0)),
            pl.BlockSpec((9, S), lambda b: (0, 0)),
            pl.BlockSpec((S, So), lambda b: (0, 0)),
            pl.BlockSpec((Cout, 9 * cin_p), lambda b: (0, 0)),
            pl.BlockSpec((Cout, 1), lambda b: (0, 0)),
            pl.BlockSpec((Cout, 9 * Cout), lambda b: (0, 0)),
            pl.BlockSpec((Cout, 1), lambda b: (0, 0)),
            pl.BlockSpec((Cout, cin_p), lambda b: (0, 0)),
            pl.BlockSpec((Cout, 1), lambda b: (0, 0)),
            pl.BlockSpec((3 * Cout, Cout), lambda b: (0, 0)),
            pl.BlockSpec((Cout, Cout), lambda b: (0, 0)),
            pl.BlockSpec((Cout, 9 * Cout), lambda b: (0, 0)),
            pl.BlockSpec((Cout, 1), lambda b: (0, 0)),
        ],
        out_specs=(pl.BlockSpec((None, Cout, S), lambda b: (b, 0, 0)),
                   pl.BlockSpec((None, Cout, So), lambda b: (b, 0, 0))),
        compiler_params=pltpu.CompilerParams(
            dimension_semantics=("parallel",),
            # Real raise only on v5e (16 MiB default); already the default
            # scoped limit on v6e/v7x, so generation-safe.
            vmem_limit_bytes=32 * 1024 * 1024),
    )(x_tok, mask_bf16, prep["tapmask"], prep["sel"],
      prep["w1"], prep["b1"], prep["w2"], prep["b2"],
      prep["ws"], prep["bs"], prep["wqkv"], prep["wo"],
      prep["wd"], prep["bd"])


# ---------------------------------------------------------------------------
# Parameter prep: fold BN, channel-major weight layout, fuse QKV, bf16 operands
# ---------------------------------------------------------------------------
def _prep_layer(p, cin, H, W):
    cout = p["conv1_w"].shape[0]
    cin_p = max(_round_up(cin, 8), 8)           # 8-aligned sublane slab pieces
    shifts, tapmask = _tap_geometry(H, W)
    sel, Ho, Wo = _stride2_selector(H, W)

    def conv_cm(w_oihw, ci_pad):                # (Co,Ci,3,3) -> (Co, 9*ci_pad)
        co, ci, kh, kw = w_oihw.shape
        w = jnp.transpose(w_oihw, (0, 2, 3, 1))              # (Co, 3, 3, Ci)
        w = jnp.pad(w, ((0, 0), (0, 0), (0, 0), (0, ci_pad - ci)))
        return w.reshape(co, kh * kw * ci_pad)

    has_proj = cin != cout
    if has_proj:
        ws = p["short_w"].reshape(cout, cin) * BN_SCALE
        ws = jnp.pad(ws, ((0, 0), (0, cin_p - cin))).astype(jnp.bfloat16)
        bs = (p["short_b"] * BN_SCALE).reshape(cout, 1).astype(jnp.float32)
    else:
        ws = jnp.zeros((cout, cin_p), jnp.bfloat16)   # unused (identity path)
        bs = jnp.zeros((cout, 1), jnp.float32)

    # channel-major projections: q_cm = wq.T @ r_cm (1/sqrt(C) folded into Q)
    scale = 1.0 / math.sqrt(cout)
    wqkv = jnp.concatenate([p["wq"].T * scale, p["wk"].T, p["wv"].T], axis=0)

    return {
        "cout": cout, "cin_p": cin_p, "so": Ho * Wo, "ho_wo": (Ho, Wo),
        "has_proj": has_proj, "shifts": shifts,
        "tapmask": tapmask, "sel": sel,
        "w1": (conv_cm(p["conv1_w"], cin_p) * BN_SCALE).astype(jnp.bfloat16),
        "b1": (p["conv1_b"] * BN_SCALE).reshape(cout, 1).astype(jnp.float32),
        "w2": (conv_cm(p["conv2_w"], cout) * BN_SCALE).astype(jnp.bfloat16),
        "b2": (p["conv2_b"] * BN_SCALE).reshape(cout, 1).astype(jnp.float32),
        "ws": ws, "bs": bs,
        "wqkv": wqkv.astype(jnp.bfloat16),
        "wo": p["wo"].T.astype(jnp.bfloat16),
        "wd": conv_cm(p["down_w"], cout).astype(jnp.bfloat16),
        "bd": p["down_b"].reshape(cout, 1).astype(jnp.float32),
    }


# ---------------------------------------------------------------------------
# ResEncoder forward
# ---------------------------------------------------------------------------
def res_encoder_forward(x_nchw, mask, params):
    """x: (N, C, H, W) NCHW, mask: (N, H*W, H*W) additive attention mask.

    Returns (downsampled output NCHW, [(resO, tranO), ...]) like PyTorch.
    NCHW flattened to (N, C, H*W) is already channel-major, so no transposes
    are needed anywhere.
    """
    N, _, H, W = x_nchw.shape
    mask_bf16 = mask.astype(jnp.bfloat16)       # halve mask HBM traffic
    # TODO(synk): PyTorch reuses the same mask every layer; for num_layers > 1
    #             its (H*W, H*W) shape no longer matches the halved resolution.
    skips = []
    x_tok = x_nchw.reshape(N, x_nchw.shape[1], H * W)
    for p in params["layers"]:
        cin = x_tok.shape[1]
        prep = _prep_layer(p, cin, H, W)
        if prep["cin_p"] != cin:
            x_tok = jnp.pad(x_tok, ((0, 0), (0, prep["cin_p"] - cin), (0, 0)))
        res_tok, down_tok = _fused_res_block(
            x_tok.astype(jnp.bfloat16), mask_bf16, prep)
        cout = prep["cout"]
        res_o = res_tok.reshape(N, cout, H, W)  # channel-major == NCHW already
        skips.append((res_o, res_o))            # resO and tranO alias
        H, W = prep["ho_wo"]
        x_tok = down_tok                        # stays channel-major (N, C, S)
    return x_tok.reshape(N, x_tok.shape[1], H, W), skips


res_encoder_forward_jit = jax.jit(res_encoder_forward)


# ---------------------------------------------------------------------------
# Deterministic parameter construction
# ---------------------------------------------------------------------------
def init_params(key, in_channels, out_channels, resnet_bias=False):
    layers = []
    for cin, cout in zip(in_channels, out_channels):
        keys = jax.random.split(key, 12)
        key = keys[-1]

        def w(k, shape, fan_in):
            return (jax.random.normal(k, shape, jnp.float32)
                    * math.sqrt(2.0 / fan_in)).astype(jnp.float32)

        zeros_c = jnp.zeros((cout,), jnp.float32)
        layer = {
            "conv1_w": w(keys[0], (cout, cin, 3, 3), cin * 9),
            "conv1_b": zeros_c,                 # resnet_bias=False
            "conv2_w": w(keys[1], (cout, cout, 3, 3), cout * 9),
            "conv2_b": zeros_c,
            "short_w": w(keys[2], (cout, cin, 1, 1), cin),
            "short_b": zeros_c,
            "wq": w(keys[3], (cout, cout), cout),
            "wk": w(keys[4], (cout, cout), cout),
            "wv": w(keys[5], (cout, cout), cout),
            "wo": w(keys[6], (cout, cout), cout),
            "down_w": w(keys[7], (cout, cout, 3, 3), cout * 9),
            "down_b": 0.01 * jax.random.normal(keys[8], (cout,), jnp.float32),
        }
        layers.append(layer)
    return {"layers": layers}


# ---------------------------------------------------------------------------
if __name__ == "__main__":
    # ResEncoder(in_channels=[4], out_channels=[8], patch_dim=16, n_heads=1,
    #            num_layers=1); input x is NCHW (2, 4, 16, 16).
    key = jax.random.PRNGKey(0)
    k_x, k_p = jax.random.split(key)

    N, C_in, H, W = 2, 4, 16, 16
    x = jax.random.normal(k_x, (N, C_in, H, W), jnp.float32)
    mask = jnp.zeros((N, H * W, H * W), jnp.float32)  # additive attention mask

    params = init_params(k_p, in_channels=[4], out_channels=[8])

    out, skips = res_encoder_forward_jit(x, mask, params)
    out = jax.block_until_ready(out)
    for res_o, tran_o in skips:
        jax.block_until_ready(res_o)
        jax.block_until_ready(tran_o)

    assert out.shape == (N, 8, H // 2, W // 2), out.shape
    assert skips[0][0].shape == (N, 8, H, W), skips[0][0].shape
    assert jnp.all(jnp.isfinite(out))
    assert jnp.all(jnp.isfinite(skips[0][0]))
    print("KERNEL_OK")
</pallas_src>

<mosaic_0001>
module attributes {stable_mosaic.version = 11 : i64} {
  func.func @_res_block_kernel(%arg0: i32, %arg1: memref<1x8x256xbf16, #tpu.memory_space<vmem>>, %arg2: memref<1x256x256xbf16, #tpu.memory_space<vmem>>, %arg3: memref<9x256xf32, #tpu.memory_space<vmem>>, %arg4: memref<256x64xf32, #tpu.memory_space<vmem>>, %arg5: memref<8x72xbf16, #tpu.memory_space<vmem>>, %arg6: memref<8x1xf32, #tpu.memory_space<vmem>>, %arg7: memref<8x72xbf16, #tpu.memory_space<vmem>>, %arg8: memref<8x1xf32, #tpu.memory_space<vmem>>, %arg9: memref<8x8xbf16, #tpu.memory_space<vmem>>, %arg10: memref<8x1xf32, #tpu.memory_space<vmem>>, %arg11: memref<24x8xbf16, #tpu.memory_space<vmem>>, %arg12: memref<8x8xbf16, #tpu.memory_space<vmem>>, %arg13: memref<8x72xbf16, #tpu.memory_space<vmem>>, %arg14: memref<8x1xf32, #tpu.memory_space<vmem>>, %arg15: memref<1x8x256xf32, #tpu.memory_space<vmem>>, %arg16: memref<1x8x64xf32, #tpu.memory_space<vmem>>) attributes {dimension_semantics = [#tpu.dimension_semantics<parallel>], iteration_bounds = array<i64: 2>, scalar_prefetch = 0 : i64, scratch_operands = 0 : i64, tpu.core_type = #tpu.core_type<tc>, window_params = [{transform_indices = @transform_0, window_bounds = array<i64: 1, 8, 256>}, {transform_indices = @transform_1, window_bounds = array<i64: 1, 256, 256>}, {pipeline_mode = #tpu.pipeline_mode<synchronous>, transform_indices = @transform_2, window_bounds = array<i64: 9, 256>}, {pipeline_mode = #tpu.pipeline_mode<synchronous>, transform_indices = @transform_3, window_bounds = array<i64: 256, 64>}, {pipeline_mode = #tpu.pipeline_mode<synchronous>, transform_indices = @transform_4, window_bounds = array<i64: 8, 72>}, {pipeline_mode = #tpu.pipeline_mode<synchronous>, transform_indices = @transform_5, window_bounds = array<i64: 8, 1>}, {pipeline_mode = #tpu.pipeline_mode<synchronous>, transform_indices = @transform_6, window_bounds = array<i64: 8, 72>}, {pipeline_mode = #tpu.pipeline_mode<synchronous>, transform_indices = @transform_7, window_bounds = array<i64: 8, 1>}, {pipeline_mode = #tpu.pipeline_mode<synchronous>, transform_indices = @transform_8, window_bounds = array<i64: 8, 8>}, {pipeline_mode = #tpu.pipeline_mode<synchronous>, transform_indices = @transform_9, window_bounds = array<i64: 8, 1>}, {pipeline_mode = #tpu.pipeline_mode<synchronous>, transform_indices = @transform_10, window_bounds = array<i64: 24, 8>}, {pipeline_mode = #tpu.pipeline_mode<synchronous>, transform_indices = @transform_11, window_bounds = array<i64: 8, 8>}, {pipeline_mode = #tpu.pipeline_mode<synchronous>, transform_indices = @transform_12, window_bounds = array<i64: 8, 72>}, {pipeline_mode = #tpu.pipeline_mode<synchronous>, transform_indices = @transform_13, window_bounds = array<i64: 8, 1>}, {transform_indices = @transform_14, window_bounds = array<i64: 1, 8, 256>}, {transform_indices = @transform_15, window_bounds = array<i64: 1, 8, 64>}]} {
    %c0 = arith.constant 0 : index
    %c0_0 = arith.constant 0 : index
    %c0_1 = arith.constant 0 : index
    %0 = vector.load %arg1[%c0, %c0_0, %c0_1] : memref<1x8x256xbf16, #tpu.memory_space<vmem>>, vector<1x8x256xbf16>
    %1 = vector.shape_cast %0 : vector<1x8x256xbf16> to vector<8x256xbf16>
    %2 = arith.extf %1 : vector<8x256xbf16> to vector<8x256xf32>
    %c0_2 = arith.constant 0 : index
    %c0_3 = arith.constant 0 : index
    %3 = vector.load %arg5[%c0_2, %c0_3] : memref<8x72xbf16, #tpu.memory_space<vmem>>, vector<8x72xbf16>
    %c17_i32 = arith.constant 17 : i32
    %4 = tpu.dynamic_rotate %2 by %c17_i32 dim 1 : vector<8x256xf32>, i32 -> vector<8x256xf32>
    %c0_4 = arith.constant 0 : index
    %c0_5 = arith.constant 0 : index
    %5 = vector.load %arg3[%c0_4, %c0_5] : memref<9x256xf32, #tpu.memory_space<vmem>>, vector<1x256xf32>
    %6 = vector.broadcast %5 : vector<1x256xf32> to vector<8x256xf32>
    %7 = arith.mulf %4, %6 : vector<8x256xf32>
    %c16_i32 = arith.constant 16 : i32
    %8 = tpu.dynamic_rotate %2 by %c16_i32 dim 1 : vector<8x256xf32>, i32 -> vector<8x256xf32>
    %c1 = arith.constant 1 : index
    %c0_6 = arith.constant 0 : index
    %9 = vector.load %arg3[%c1, %c0_6] : memref<9x256xf32, #tpu.memory_space<vmem>>, vector<1x256xf32>
    %10 = vector.broadcast %9 : vector<1x256xf32> to vector<8x256xf32>
    %11 = arith.mulf %8, %10 : vector<8x256xf32>
    %c15_i32 = arith.constant 15 : i32
    %12 = tpu.dynamic_rotate %2 by %c15_i32 dim 1 : vector<8x256xf32>, i32 -> vector<8x256xf32>
    %c2 = arith.constant 2 : index
    %c0_7 = arith.constant 0 : index
    %13 = vector.load %arg3[%c2, %c0_7] : memref<9x256xf32, #tpu.memory_space<vmem>>, vector<1x256xf32>
    %14 = vector.broadcast %13 : vector<1x256xf32> to vector<8x256xf32>
    %15 = arith.mulf %12, %14 : vector<8x256xf32>
    %c1_i32 = arith.constant 1 : i32
    %16 = tpu.dynamic_rotate %2 by %c1_i32 dim 1 : vector<8x256xf32>, i32 -> vector<8x256xf32>
    %c3 = arith.constant 3 : index
    %c0_8 = arith.constant 0 : index
    %17 = vector.load %arg3[%c3, %c0_8] : memref<9x256xf32, #tpu.memory_space<vmem>>, vector<1x256xf32>
    %18 = vector.broadcast %17 : vector<1x256xf32> to vector<8x256xf32>
    %19 = arith.mulf %16, %18 : vector<8x256xf32>
    %c255_i32 = arith.constant 255 : i32
    %20 = tpu.dynamic_rotate %2 by %c255_i32 dim 1 : vector<8x256xf32>, i32 -> vector<8x256xf32>
    %c5 = arith.constant 5 : index
    %c0_9 = arith.constant 0 : index
    %21 = vector.load %arg3[%c5, %c0_9] : memref<9x256xf32, #tpu.memory_space<vmem>>, vector<1x256xf32>
    %22 = vector.broadcast %21 : vector<1x256xf32> to vector<8x256xf32>
    %23 = arith.mulf %20, %22 : vector<8x256xf32>
    %c241_i32 = arith.constant 241 : i32
    %24 = tpu.dynamic_rotate %2 by %c241_i32 dim 1 : vector<8x256xf32>, i32 -> vector<8x256xf32>
    %c6 = arith.constant 6 : index
    %c0_10 = arith.constant 0 : index
    %25 = vector.load %arg3[%c6, %c0_10] : memref<9x256xf32, #tpu.memory_space<vmem>>, vector<1x256xf32>
    %26 = vector.broadcast %25 : vector<1x256xf32> to vector<8x256xf32>
    %27 = arith.mulf %24, %26 : vector<8x256xf32>
    %c240_i32 = arith.constant 240 : i32
    %28 = tpu.dynamic_rotate %2 by %c240_i32 dim 1 : vector<8x256xf32>, i32 -> vector<8x256xf32>
    %c7 = arith.constant 7 : index
    %c0_11 = arith.constant 0 : index
    %29 = vector.load %arg3[%c7, %c0_11] : memref<9x256xf32, #tpu.memory_space<vmem>>, vector<1x256xf32>
    %30 = vector.broadcast %29 : vector<1x256xf32> to vector<8x256xf32>
    %31 = arith.mulf %28, %30 : vector<8x256xf32>
    %c239_i32 = arith.constant 239 : i32
    %32 = tpu.dynamic_rotate %2 by %c239_i32 dim 1 : vector<8x256xf32>, i32 -> vector<8x256xf32>
    %c8 = arith.constant 8 : index
    %c0_12 = arith.constant 0 : index
    %33 = vector.load %arg3[%c8, %c0_12] : memref<9x256xf32, #tpu.memory_space<vmem>>, vector<1x256xf32>
    %34 = vector.broadcast %33 : vector<1x256xf32> to vector<8x256xf32>
    %35 = arith.mulf %32, %34 : vector<8x256xf32>
    %36 = tpu.concatenate %7, %11, %15, %19, %2, %23, %27, %31, %35 in 0 : vector<8x256xf32>, vector<8x256xf32>, vector<8x256xf32>, vector<8x256xf32>, vector<8x256xf32>, vector<8x256xf32>, vector<8x256xf32>, vector<8x256xf32>, vector<8x256xf32> -> vector<72x256xf32>
    %37 = arith.truncf %36 : vector<72x256xf32> to vector<72x256xbf16>
    %cst = arith.constant dense<0.000000e+00> : vector<8x256xf32>
    %38 = tpu.matmul %3, %37, %cst {dimension_numbers = #tpu.dot_dimension_numbers<[1], [0], [0], [1], [0, 0, 1, 1], [], []>} : vector<8x72xbf16>, vector<72x256xbf16>, vector<8x256xf32> -> vector<8x256xf32>
    %c0_13 = arith.constant 0 : index
    %c0_14 = arith.constant 0 : index
    %39 = vector.load %arg6[%c0_13, %c0_14] : memref<8x1xf32, #tpu.memory_space<vmem>>, vector<8x1xf32>
    %40 = vector.broadcast %39 : vector<8x1xf32> to vector<8x256xf32>
    %41 = arith.addf %38, %40 : vector<8x256xf32>
    %cst_15 = arith.constant 0.000000e+00 : f32
    %42 = vector.broadcast %cst_15 : f32 to vector<8x256xf32>
    %43 = arith.maximumf %41, %42 : vector<8x256xf32>
    %c0_16 = arith.constant 0 : index
    %c0_17 = arith.constant 0 : index
    %44 = vector.load %arg7[%c0_16, %c0_17] : memref<8x72xbf16, #tpu.memory_space<vmem>>, vector<8x72xbf16>
    %c17_i32_18 = arith.constant 17 : i32
    %45 = tpu.dynamic_rotate %43 by %c17_i32_18 dim 1 : vector<8x256xf32>, i32 -> vector<8x256xf32>
    %c0_19 = arith.constant 0 : index
    %c0_20 = arith.constant 0 : index
    %46 = vector.load %arg3[%c0_19, %c0_20] : memref<9x256xf32, #tpu.memory_space<vmem>>, vector<1x256xf32>
    %47 = vector.broadcast %46 : vector<1x256xf32> to vector<8x256xf32>
    %48 = arith.mulf %45, %47 : vector<8x256xf32>
    %c16_i32_21 = arith.constant 16 : i32
    %49 = tpu.dynamic_rotate %43 by %c16_i32_21 dim 1 : vector<8x256xf32>, i32 -> vector<8x256xf32>
    %c1_22 = arith.constant 1 : index
    %c0_23 = arith.constant 0 : index
    %50 = vector.load %arg3[%c1_22, %c0_23] : memref<9x256xf32, #tpu.memory_space<vmem>>, vector<1x256xf32>
    %51 = vector.broadcast %50 : vector<1x256xf32> to vector<8x256xf32>
    %52 = arith.mulf %49, %51 : vector<8x256xf32>
    %c15_i32_24 = arith.constant 15 : i32
    %53 = tpu.dynamic_rotate %43 by %c15_i32_24 dim 1 : vector<8x256xf32>, i32 -> vector<8x256xf32>
    %c2_25 = arith.constant 2 : index
    %c0_26 = arith.constant 0 : index
    %54 = vector.load %arg3[%c2_25, %c0_26] : memref<9x256xf32, #tpu.memory_space<vmem>>, vector<1x256xf32>
    %55 = vector.broadcast %54 : vector<1x256xf32> to vector<8x256xf32>
    %56 = arith.mulf %53, %55 : vector<8x256xf32>
    %c1_i32_27 = arith.constant 1 : i32
    %57 = tpu.dynamic_rotate %43 by %c1_i32_27 dim 1 : vector<8x256xf32>, i32 -> vector<8x256xf32>
    %c3_28 = arith.constant 3 : index
    %c0_29 = arith.constant 0 : index
    %58 = vector.load %arg3[%c3_28, %c0_29] : memref<9x256xf32, #tpu.memory_space<vmem>>, vector<1x256xf32>
    %59 = vector.broadcast %58 : vector<1x256xf32> to vector<8x256xf32>
    %60 = arith.mulf %57, %59 : vector<8x256xf32>
    %c255_i32_30 = arith.constant 255 : i32
    %61 = tpu.dynamic_rotate %43 by %c255_i32_30 dim 1 : vector<8x256xf32>, i32 -> vector<8x256xf32>
    %c5_31 = arith.constant 5 : index
    %c0_32 = arith.constant 0 : index
    %62 = vector.load %arg3[%c5_31, %c0_32] : memref<9x256xf32, #tpu.memory_space<vmem>>, vector<1x256xf32>
    %63 = vector.broadcast %62 : vector<1x256xf32> to vector<8x256xf32>
    %64 = arith.mulf %61, %63 : vector<8x256xf32>
    %c241_i32_33 = arith.constant 241 : i32
    %65 = tpu.dynamic_rotate %43 by %c241_i32_33 dim 1 : vector<8x256xf32>, i32 -> vector<8x256xf32>
    %c6_34 = arith.constant 6 : index
    %c0_35 = arith.constant 0 : index
    %66 = vector.load %arg3[%c6_34, %c0_35] : memref<9x256xf32, #tpu.memory_space<vmem>>, vector<1x256xf32>
    %67 = vector.broadcast %66 : vector<1x256xf32> to vector<8x256xf32>
    %68 = arith.mulf %65, %67 : vector<8x256xf32>
    %c240_i32_36 = arith.constant 240 : i32
    %69 = tpu.dynamic_rotate %43 by %c240_i32_36 dim 1 : vector<8x256xf32>, i32 -> vector<8x256xf32>
    %c7_37 = arith.constant 7 : index
    %c0_38 = arith.constant 0 : index
    %70 = vector.load %arg3[%c7_37, %c0_38] : memref<9x256xf32, #tpu.memory_space<vmem>>, vector<1x256xf32>
    %71 = vector.broadcast %70 : vector<1x256xf32> to vector<8x256xf32>
    %72 = arith.mulf %69, %71 : vector<8x256xf32>
    %c239_i32_39 = arith.constant 239 : i32
    %73 = tpu.dynamic_rotate %43 by %c239_i32_39 dim 1 : vector<8x256xf32>, i32 -> vector<8x256xf32>
    %c8_40 = arith.constant 8 : index
    %c0_41 = arith.constant 0 : index
    %74 = vector.load %arg3[%c8_40, %c0_41] : memref<9x256xf32, #tpu.memory_space<vmem>>, vector<1x256xf32>
    %75 = vector.broadcast %74 : vector<1x256xf32> to vector<8x256xf32>
    %76 = arith.mulf %73, %75 : vector<8x256xf32>
    %77 = tpu.concatenate %48, %52, %56, %60, %43, %64, %68, %72, %76 in 0 : vector<8x256xf32>, vector<8x256xf32>, vector<8x256xf32>, vector<8x256xf32>, vector<8x256xf32>, vector<8x256xf32>, vector<8x256xf32>, vector<8x256xf32>, vector<8x256xf32> -> vector<72x256xf32>
    %78 = arith.truncf %77 : vector<72x256xf32> to vector<72x256xbf16>
    %cst_42 = arith.constant dense<0.000000e+00> : vector<8x256xf32>
    %79 = tpu.matmul %44, %78, %cst_42 {dimension_numbers = #tpu.dot_dimension_numbers<[1], [0], [0], [1], [0, 0, 1, 1], [], []>} : vector<8x72xbf16>, vector<72x256xbf16>, vector<8x256xf32> -> vector<8x256xf32>
    %c0_43 = arith.constant 0 : index
    %c0_44 = arith.constant 0 : index
    %80 = vector.load %arg8[%c0_43, %c0_44] : memref<8x1xf32, #tpu.memory_space<vmem>>, vector<8x1xf32>
    %81 = vector.broadcast %80 : vector<8x1xf32> to vector<8x256xf32>
    %82 = arith.addf %79, %81 : vector<8x256xf32>
    %c0_45 = arith.constant 0 : index
    %c0_46 = arith.constant 0 : index
    %83 = vector.load %arg9[%c0_45, %c0_46] : memref<8x8xbf16, #tpu.memory_space<vmem>>, vector<8x8xbf16>
    %c0_47 = arith.constant 0 : index
    %c0_48 = arith.constant 0 : index
    %c0_49 = arith.constant 0 : index
    %84 = vector.load %arg1[%c0_47, %c0_48, %c0_49] : memref<1x8x256xbf16, #tpu.memory_space<vmem>>, vector<1x8x256xbf16>
    %85 = vector.shape_cast %84 : vector<1x8x256xbf16> to vector<8x256xbf16>
    %cst_50 = arith.constant dense<0.000000e+00> : vector<8x256xf32>
    %86 = tpu.matmul %83, %85, %cst_50 {dimension_numbers = #tpu.dot_dimension_numbers<[1], [0], [0], [1], [0, 0, 1, 1], [], []>} : vector<8x8xbf16>, vector<8x256xbf16>, vector<8x256xf32> -> vector<8x256xf32>
    %c0_51 = arith.constant 0 : index
    %c0_52 = arith.constant 0 : index
    %87 = vector.load %arg10[%c0_51, %c0_52] : memref<8x1xf32, #tpu.memory_space<vmem>>, vector<8x1xf32>
    %88 = vector.broadcast %87 : vector<8x1xf32> to vector<8x256xf32>
    %89 = arith.addf %86, %88 : vector<8x256xf32>
    %90 = arith.addf %82, %89 : vector<8x256xf32>
    %cst_53 = arith.constant 0.000000e+00 : f32
    %91 = vector.broadcast %cst_53 : f32 to vector<8x256xf32>
    %92 = arith.maximumf %90, %91 : vector<8x256xf32>
    %93 = arith.truncf %92 : vector<8x256xf32> to vector<8x256xbf16>
    %c0_54 = arith.constant 0 : index
    %c0_55 = arith.constant 0 : index
    %94 = vector.load %arg11[%c0_54, %c0_55] : memref<24x8xbf16, #tpu.memory_space<vmem>>, vector<24x8xbf16>
    %cst_56 = arith.constant dense<0.000000e+00> : vector<24x256xf32>
    %95 = tpu.matmul %94, %93, %cst_56 {dimension_numbers = #tpu.dot_dimension_numbers<[1], [0], [0], [1], [0, 0, 1, 1], [], []>} : vector<24x8xbf16>, vector<8x256xbf16>, vector<24x256xf32> -> vector<24x256xf32>
    %96 = vector.extract_strided_slice %95 {offsets = [0, 0], sizes = [8, 256], strides = [1, 1]} : vector<24x256xf32> to vector<8x256xf32>
    %97 = vector.extract_strided_slice %95 {offsets = [8, 0], sizes = [8, 256], strides = [1, 1]} : vector<24x256xf32> to vector<8x256xf32>
    %98 = arith.truncf %97 : vector<8x256xf32> to vector<8x256xbf16>
    %99 = vector.extract_strided_slice %95 {offsets = [16, 0], sizes = [8, 256], strides = [1, 1]} : vector<24x256xf32> to vector<8x256xf32>
    %100 = arith.truncf %99 : vector<8x256xf32> to vector<8x256xbf16>
    %101 = tpu.transpose %96, [1, 0] : vector<8x256xf32> -> vector<256x8xf32>
    %102 = arith.truncf %101 : vector<256x8xf32> to vector<256x8xbf16>
    %cst_57 = arith.constant dense<0.000000e+00> : vector<256x256xf32>
    %103 = tpu.matmul %102, %98, %cst_57 {dimension_numbers = #tpu.dot_dimension_numbers<[1], [0], [0], [1], [0, 0, 1, 1], [], []>} : vector<256x8xbf16>, vector<8x256xbf16>, vector<256x256xf32> -> vector<256x256xf32>
    %c0_58 = arith.constant 0 : index
    %c0_59 = arith.constant 0 : index
    %c0_60 = arith.constant 0 : index
    %104 = vector.load %arg2[%c0_58, %c0_59, %c0_60] : memref<1x256x256xbf16, #tpu.memory_space<vmem>>, vector<1x256x256xbf16>
    %105 = vector.shape_cast %104 : vector<1x256x256xbf16> to vector<256x256xbf16>
    %106 = arith.extf %105 : vector<256x256xbf16> to vector<256x256xf32>
    %107 = arith.addf %103, %106 : vector<256x256xf32>
    %cst_61 = arith.constant dense<0xFF800000> : vector<256xf32>
    %108 = vector.multi_reduction <maximumf>, %107, %cst_61 [1] : vector<256x256xf32> to vector<256xf32>
    %109 = vector.shape_cast %108 : vector<256xf32> to vector<256x1xf32>
    %110 = vector.broadcast %109 : vector<256x1xf32> to vector<256x256xf32>
    %111 = arith.subf %107, %110 : vector<256x256xf32>
    %112 = math.exp %111 : vector<256x256xf32>
    %cst_62 = arith.constant dense<0.000000e+00> : vector<256xf32>
    %113 = vector.multi_reduction <add>, %112, %cst_62 [1] : vector<256x256xf32> to vector<256xf32>
    %114 = vector.shape_cast %113 : vector<256xf32> to vector<256x1xf32>
    %115 = vector.broadcast %114 : vector<256x1xf32> to vector<256x256xf32>
    %116 = arith.divf %112, %115 : vector<256x256xf32>
    %117 = arith.truncf %116 : vector<256x256xf32> to vector<256x256xbf16>
    %cst_63 = arith.constant dense<0.000000e+00> : vector<8x256xf32>
    %118 = tpu.matmul %100, %117, %cst_63 {dimension_numbers = #tpu.dot_dimension_numbers<[1], [1], [0], [0], [0, 0, 1, 0], [], []>} : vector<8x256xbf16>, vector<256x256xbf16>, vector<8x256xf32> -> vector<8x256xf32>
    %c0_64 = arith.constant 0 : index
    %c0_65 = arith.constant 0 : index
    %119 = vector.load %arg12[%c0_64, %c0_65] : memref<8x8xbf16, #tpu.memory_space<vmem>>, vector<8x8xbf16>
    %120 = arith.truncf %118 : vector<8x256xf32> to vector<8x256xbf16>
    %cst_66 = arith.constant dense<0.000000e+00> : vector<8x256xf32>
    %121 = tpu.matmul %119, %120, %cst_66 {dimension_numbers = #tpu.dot_dimension_numbers<[1], [0], [0], [1], [0, 0, 1, 1], [], []>} : vector<8x8xbf16>, vector<8x256xbf16>, vector<8x256xf32> -> vector<8x256xf32>
    %122 = arith.addf %92, %121 : vector<8x256xf32>
    %c0_67 = arith.constant 0 : index
    %c0_68 = arith.constant 0 : index
    %c0_69 = arith.constant 0 : index
    %123 = vector.load %arg15[%c0_67, %c0_68, %c0_69] : memref<1x8x256xf32, #tpu.memory_space<vmem>>, vector<1x8x256xf32>
    %124 = vector.shape_cast %123 : vector<1x8x256xf32> to vector<8x256xf32>
    %125 = vector.shape_cast %122 : vector<8x256xf32> to vector<1x8x256xf32>
    tpu.vector_store %arg15[%c0_67, %c0_68, %c0_69], %125 {strides = array<i32>} : memref<1x8x256xf32, #tpu.memory_space<vmem>>, vector<1x8x256xf32>,
    %c0_70 = arith.constant 0 : index
    %c0_71 = arith.constant 0 : index
    %126 = vector.load %arg13[%c0_70, %c0_71] : memref<8x72xbf16, #tpu.memory_space<vmem>>, vector<8x72xbf16>
    %c17_i32_72 = arith.constant 17 : i32
    %127 = tpu.dynamic_rotate %122 by %c17_i32_72 dim 1 : vector<8x256xf32>, i32 -> vector<8x256xf32>
    %c0_73 = arith.constant 0 : index
    %c0_74 = arith.constant 0 : index
    %128 = vector.load %arg3[%c0_73, %c0_74] : memref<9x256xf32, #tpu.memory_space<vmem>>, vector<1x256xf32>
    %129 = vector.broadcast %128 : vector<1x256xf32> to vector<8x256xf32>
    %130 = arith.mulf %127, %129 : vector<8x256xf32>
    %c16_i32_75 = arith.constant 16 : i32
    %131 = tpu.dynamic_rotate %122 by %c16_i32_75 dim 1 : vector<8x256xf32>, i32 -> vector<8x256xf32>
    %c1_76 = arith.constant 1 : index
    %c0_77 = arith.constant 0 : index
    %132 = vector.load %arg3[%c1_76, %c0_77] : memref<9x256xf32, #tpu.memory_space<vmem>>, vector<1x256xf32>
    %133 = vector.broadcast %132 : vector<1x256xf32> to vector<8x256xf32>
    %134 = arith.mulf %131, %133 : vector<8x256xf32>
    %c15_i32_78 = arith.constant 15 : i32
    %135 = tpu.dynamic_rotate %122 by %c15_i32_78 dim 1 : vector<8x256xf32>, i32 -> vector<8x256xf32>
    %c2_79 = arith.constant 2 : index
    %c0_80 = arith.constant 0 : index
    %136 = vector.load %arg3[%c2_79, %c0_80] : memref<9x256xf32, #tpu.memory_space<vmem>>, vector<1x256xf32>
    %137 = vector.broadcast %136 : vector<1x256xf32> to vector<8x256xf32>
    %138 = arith.mulf %135, %137 : vector<8x256xf32>
    %c1_i32_81 = arith.constant 1 : i32
    %139 = tpu.dynamic_rotate %122 by %c1_i32_81 dim 1 : vector<8x256xf32>, i32 -> vector<8x256xf32>
    %c3_82 = arith.constant 3 : index
    %c0_83 = arith.constant 0 : index
    %140 = vector.load %arg3[%c3_82, %c0_83] : memref<9x256xf32, #tpu.memory_space<vmem>>, vector<1x256xf32>
    %141 = vector.broadcast %140 : vector<1x256xf32> to vector<8x256xf32>
    %142 = arith.mulf %139, %141 : vector<8x256xf32>
    %c255_i32_84 = arith.constant 255 : i32
    %143 = tpu.dynamic_rotate %122 by %c255_i32_84 dim 1 : vector<8x256xf32>, i32 -> vector<8x256xf32>
    %c5_85 = arith.constant 5 : index
    %c0_86 = arith.constant 0 : index
    %144 = vector.load %arg3[%c5_85, %c0_86] : memref<9x256xf32, #tpu.memory_space<vmem>>, vector<1x256xf32>
    %145 = vector.broadcast %144 : vector<1x256xf32> to vector<8x256xf32>
    %146 = arith.mulf %143, %145 : vector<8x256xf32>
    %c241_i32_87 = arith.constant 241 : i32
    %147 = tpu.dynamic_rotate %122 by %c241_i32_87 dim 1 : vector<8x256xf32>, i32 -> vector<8x256xf32>
    %c6_88 = arith.constant 6 : index
    %c0_89 = arith.constant 0 : index
    %148 = vector.load %arg3[%c6_88, %c0_89] : memref<9x256xf32, #tpu.memory_space<vmem>>, vector<1x256xf32>
    %149 = vector.broadcast %148 : vector<1x256xf32> to vector<8x256xf32>
    %150 = arith.mulf %147, %149 : vector<8x256xf32>
    %c240_i32_90 = arith.constant 240 : i32
    %151 = tpu.dynamic_rotate %122 by %c240_i32_90 dim 1 : vector<8x256xf32>, i32 -> vector<8x256xf32>
    %c7_91 = arith.constant 7 : index
    %c0_92 = arith.constant 0 : index
    %152 = vector.load %arg3[%c7_91, %c0_92] : memref<9x256xf32, #tpu.memory_space<vmem>>, vector<1x256xf32>
    %153 = vector.broadcast %152 : vector<1x256xf32> to vector<8x256xf32>
    %154 = arith.mulf %151, %153 : vector<8x256xf32>
    %c239_i32_93 = arith.constant 239 : i32
    %155 = tpu.dynamic_rotate %122 by %c239_i32_93 dim 1 : vector<8x256xf32>, i32 -> vector<8x256xf32>
    %c8_94 = arith.constant 8 : index
    %c0_95 = arith.constant 0 : index
    %156 = vector.load %arg3[%c8_94, %c0_95] : memref<9x256xf32, #tpu.memory_space<vmem>>, vector<1x256xf32>
    %157 = vector.broadcast %156 : vector<1x256xf32> to vector<8x256xf32>
    %158 = arith.mulf %155, %157 : vector<8x256xf32>
    %159 = tpu.concatenate %130, %134, %138, %142, %122, %146, %150, %154, %158 in 0 : vector<8x256xf32>, vector<8x256xf32>, vector<8x256xf32>, vector<8x256xf32>, vector<8x256xf32>, vector<8x256xf32>, vector<8x256xf32>, vector<8x256xf32>, vector<8x256xf32> -> vector<72x256xf32>
    %160 = arith.truncf %159 : vector<72x256xf32> to vector<72x256xbf16>
    %cst_96 = arith.constant dense<0.000000e+00> : vector<8x256xf32>
    %161 = tpu.matmul %126, %160, %cst_96 {dimension_numbers = #tpu.dot_dimension_numbers<[1], [0], [0], [1], [0, 0, 1, 1], [], []>} : vector<8x72xbf16>, vector<72x256xbf16>, vector<8x256xf32> -> vector<8x256xf32>
    %c0_97 = arith.constant 0 : index
    %c0_98 = arith.constant 0 : index
    %162 = vector.load %arg4[%c0_97, %c0_98] : memref<256x64xf32, #tpu.memory_space<vmem>>, vector<256x64xf32>
    %cst_99 = arith.constant dense<0.000000e+00> : vector<8x64xf32>
    %163 = tpu.matmul %161, %162, %cst_99 {dimension_numbers = #tpu.dot_dimension_numbers<[1], [0], [0], [1], [0, 0, 1, 1], [], []>} : vector<8x256xf32>, vector<256x64xf32>, vector<8x64xf32> -> vector<8x64xf32>
    %c0_100 = arith.constant 0 : index
    %c0_101 = arith.constant 0 : index
    %164 = vector.load %arg14[%c0_100, %c0_101] : memref<8x1xf32, #tpu.memory_space<vmem>>, vector<8x1xf32>
    %165 = vector.broadcast %164 : vector<8x1xf32> to vector<8x64xf32>
    %166 = arith.addf %163, %165 : vector<8x64xf32>
    %c0_102 = arith.constant 0 : index
    %c0_103 = arith.constant 0 : index
    %c0_104 = arith.constant 0 : index
    %167 = vector.load %arg16[%c0_102, %c0_103, %c0_104] : memref<1x8x64xf32, #tpu.memory_space<vmem>>, vector<1x8x64xf32>
    %168 = vector.shape_cast %167 : vector<1x8x64xf32> to vector<8x64xf32>
    %169 = vector.shape_cast %166 : vector<8x64xf32> to vector<1x8x64xf32>
    tpu.vector_store %arg16[%c0_102, %c0_103, %c0_104], %169 {strides = array<i32>} : memref<1x8x64xf32, #tpu.memory_space<vmem>>, vector<1x8x64xf32>,
    return
  }
  func.func @transform_0(%arg0: i32) -> (i32, i32, i32) {
    %c0_i32 = arith.constant 0 : i32
    %c0_i32_0 = arith.constant 0 : i32
    %c0_i32_1 = arith.constant 0 : i32
    return %arg0, %c0_i32, %c0_i32_0 : i32, i32, i32
  }
  func.func @transform_1(%arg0: i32) -> (i32, i32, i32) {
    %c0_i32 = arith.constant 0 : i32
    %c0_i32_0 = arith.constant 0 : i32
    %c0_i32_1 = arith.constant 0 : i32
    return %arg0, %c0_i32, %c0_i32_0 : i32, i32, i32
  }
  func.func @transform_2(%arg0: i32) -> (i32, i32) {
    %c0_i32 = arith.constant 0 : i32
    %c0_i32_0 = arith.constant 0 : i32
    %c0_i32_1 = arith.constant 0 : i32
    return %c0_i32, %c0_i32_0 : i32, i32
  }
  func.func @transform_3(%arg0: i32) -> (i32, i32) {
    %c0_i32 = arith.constant 0 : i32
    %c0_i32_0 = arith.constant 0 : i32
    %c0_i32_1 = arith.constant 0 : i32
    return %c0_i32, %c0_i32_0 : i32, i32
  }
  func.func @transform_4(%arg0: i32) -> (i32, i32) {
    %c0_i32 = arith.constant 0 : i32
    %c0_i32_0 = arith.constant 0 : i32
    %c0_i32_1 = arith.constant 0 : i32
    return %c0_i32, %c0_i32_0 : i32, i32
  }
  func.func @transform_5(%arg0: i32) -> (i32, i32) {
    %c0_i32 = arith.constant 0 : i32
    %c0_i32_0 = arith.constant 0 : i32
    %c0_i32_1 = arith.constant 0 : i32
    return %c0_i32, %c0_i32_0 : i32, i32
  }
  func.func @transform_6(%arg0: i32) -> (i32, i32) {
    %c0_i32 = arith.constant 0 : i32
    %c0_i32_0 = arith.constant 0 : i32
    %c0_i32_1 = arith.constant 0 : i32
    return %c0_i32, %c0_i32_0 : i32, i32
  }
  func.func @transform_7(%arg0: i32) -> (i32, i32) {
    %c0_i32 = arith.constant 0 : i32
    %c0_i32_0 = arith.constant 0 : i32
    %c0_i32_1 = arith.constant 0 : i32
    return %c0_i32, %c0_i32_0 : i32, i32
  }
  func.func @transform_8(%arg0: i32) -> (i32, i32) {
    %c0_i32 = arith.constant 0 : i32
    %c0_i32_0 = arith.constant 0 : i32
    %c0_i32_1 = arith.constant 0 : i32
    return %c0_i32, %c0_i32_0 : i32, i32
  }
  func.func @transform_9(%arg0: i32) -> (i32, i32) {
    %c0_i32 = arith.constant 0 : i32
    %c0_i32_0 = arith.constant 0 : i32
    %c0_i32_1 = arith.constant 0 : i32
    return %c0_i32, %c0_i32_0 : i32, i32
  }
  func.func @transform_10(%arg0: i32) -> (i32, i32) {
    %c0_i32 = arith.constant 0 : i32
    %c0_i32_0 = arith.constant 0 : i32
    %c0_i32_1 = arith.constant 0 : i32
    return %c0_i32, %c0_i32_0 : i32, i32
  }
  func.func @transform_11(%arg0: i32) -> (i32, i32) {
    %c0_i32 = arith.constant 0 : i32
    %c0_i32_0 = arith.constant 0 : i32
    %c0_i32_1 = arith.constant 0 : i32
    return %c0_i32, %c0_i32_0 : i32, i32
  }
  func.func @transform_12(%arg0: i32) -> (i32, i32) {
    %c0_i32 = arith.constant 0 : i32
    %c0_i32_0 = arith.constant 0 : i32
    %c0_i32_1 = arith.constant 0 : i32
    return %c0_i32, %c0_i32_0 : i32, i32
  }
  func.func @transform_13(%arg0: i32) -> (i32, i32) {
    %c0_i32 = arith.constant 0 : i32
    %c0_i32_0 = arith.constant 0 : i32
    %c0_i32_1 = arith.constant 0 : i32
    return %c0_i32, %c0_i32_0 : i32, i32
  }
  func.func @transform_14(%arg0: i32) -> (i32, i32, i32) {
    %c0_i32 = arith.constant 0 : i32
    %c0_i32_0 = arith.constant 0 : i32
    %c0_i32_1 = arith.constant 0 : i32
    return %arg0, %c0_i32, %c0_i32_0 : i32, i32, i32
  }
  func.func @transform_15(%arg0: i32) -> (i32, i32, i32) {
    %c0_i32 = arith.constant 0 : i32
    %c0_i32_0 = arith.constant 0 : i32
    %c0_i32_1 = arith.constant 0 : i32
    return %arg0, %c0_i32, %c0_i32_0 : i32, i32, i32
  }
}

</mosaic_0001>

<bundles_post_ra>
// kernel: res_encoder_forward.1
= control target key start
LH: loop header
LB: loop body
LE: loop exit
PB: predicated region body
PF: predicated region fallthrough
CT: control target
= control target key end

     0   :  { %s2971_s18 = smov 0   ;;  %s4223_s0 = inlined_call_operand.vmem [shape: bf16[2,8,256], index: 0, kind: input, shape index: {}]   ;;  %s4224_s1 = inlined_call_operand.vmem [shape: bf16[2,256,256], index: 1, kind: input, shape index: {}]   ;;  %s4225_s2 = inlined_call_operand.vmem [shape: f32[9,256], index: 2, kind: input, shape index: {}]   ;;  %s4226_s3 = inlined_call_operand.vmem [shape: f32[256,64], index: 3, kind: input, shape index: {}]   ;;  %s4227_s4 = inlined_call_operand.vmem [shape: bf16[8,72], index: 4, kind: input, shape index: {}]   ;;  %s4228_s5 = inlined_call_operand.vmem [shape: f32[8,1], index: 5, kind: input, shape index: {}]   ;;  %s4229_s6 = inlined_call_operand.vmem [shape: bf16[8,72], index: 6, kind: input, shape index: {}]   ;;  %s4230_s7 = inlined_call_operand.vmem [shape: f32[8,1], index: 7, kind: input, shape index: {}]   ;;  %s4231_s8 = inlined_call_operand.vmem [shape: bf16[8,8], index: 8, kind: input, shape index: {}]   ;;  %s4232_s9 = inlined_call_operand.vmem [shape: f32[8,1], index: 9, kind: input, shape index: {}]   ;;  %s4233_s10 = inlined_call_operand.vmem [shape: bf16[24,8], index: 10, kind: input, shape index: {}]   ;;  %s4234_s11 = inlined_call_operand.vmem [shape: bf16[8,8], index: 11, kind: input, shape index: {}]   ;;  %s4235_s12 = inlined_call_operand.vmem [shape: bf16[8,72], index: 12, kind: input, shape index: {}]   ;;  %s4236_s13 = inlined_call_operand.vmem [shape: f32[8,1], index: 13, kind: input, shape index: {}]   ;;  %s4237_s14 = inlined_call_operand.vmem [shape: f32[2,8,256], index: 14, kind: output, shape index: {0}]   ;;  %s4238_s15 = inlined_call_operand.vmem [shape: f32[2,8,64], index: 15, kind: output, shape index: {1}]  }
   0x1 LB: > { %s2518_s19 = sadd.s32 4294967295, %s2880_s18   ;;  %p2522_p0 = scmp.ge.s32.totalorder %s2880_s18, 1  ;;  %s2880_s18 = sphi %s2971_s18, %s26_s18  }
   0x2   : > { %p450_p1 = scmp.lt.s32.totalorder %s2880_s18, 3 }
   0x4   : > { %p451_p2 = pnand %p2522_p0, %p450_p1 }
   0x6   : > { %454 = sbr.rel (%p451_p2) target bundleno = 2772 (0xad4), region = 76 }
   0xb   : > { %p507_p3 = scmp.lt.s32.totalorder %s2518_s19, 1  ;;  %s2882_s24 = smov 111   ;;  %v4246_v4 = vmov 0   ;;  %v718_v5 = vld [vmem:[%s4228_s5] sm:$0xff]  ;;  %v535_v6 = vlaneseq  ;;  %vm728_vm3 = vcmask 1043456   ;;  %vm724_vm9 = vcmask 588800  }
   0xc   : > { %s2883_s25 = smov 112   ;;  %s2884_s26 = smov 113   ;;  %767 = vmatprep.mubr.bf16.mxu0 %v4246_v4  ;;  %2676 = vset.pattern.permute.xlu0 %v4246_v4  ;;  %v2536_v11 = vld [vmem:[%s4225_s2 + $0x10] ss:$8 sm:$0x3]  ;;  %vm921_vm10 = vcmask 64512  }
   0xd   : > { %s4372_s19 = smov (!%p507_p3, %s2518_s19), 1  ;;  %s2885_s27 = smov 127   ;;  %900 = vmatprep.mubr.bf16.mxu1 %v4246_v4  ;;  %2677 = vset.pattern.permute.xlu1 %v4246_v4  ;;  %v543_v7 = vshrl.u32 %v535_v6, 7  ;;  %v3010_v8 = vand.u32 127, %v535_v6  ;;  %vm2418_vm11 = vcmask 523264  }
   0xe   : > { %s4239_s20 = sshll.u32 %s4372_s19, 3  ;;  %s4244_s28 = smov 1   ;;  %v2534_v12 = vld [vmem:[%s4225_s2 + $0x6] ss:$8 sm:$0x3] }
   0xf   : > { %s511_s23 = scalar_lea.vmem %s4223_s0, %s4239_s20  ;;  %s4281_s29 = smov 15   ;;  %4283 = vst [vmem:[#allocation2_spill] sm:$0xff] %v3010_v8  ;;  %v3012_v9 = vsub.s32 1, %v543_v7  ;;  %v3014_v10 = vsub.s32 0, %v543_v7  ;;  %vm690_vm0 = vcmp.lt.s32.totalorder %v3010_v8, 111  ;;  %vm646_vm1 = vcmp.lt.s32.totalorder %v3010_v8, 113 }
  0x10   : > { %v2987_v0 = vld [vmem:[%s511_s23] sm:$0xff]  ;;  %s4240_s30 = smov 16   ;;  %s4242_s16 = smov 17   ;;  %vm668_vm2 = vcmp.lt.s32.totalorder %v3010_v8, 112  ;;  %vm624_vm4 = vcmp.lt.s32.totalorder %v3010_v8, 127  ;;  %vm580_vm5 = vcmp.lt.s32.totalorder %v3010_v8, 15 }
  0x11   : > { %v528_v1 = vunpack.c.l.bf16 %v2987_v0  ;;  %v529_v2 = vunpack.c.h.bf16 %v2987_v0  ;;  %4284 = vst [vmem:[#allocation3_spill] sm:$0xff] %v3012_v9  ;;  %4285 = vst [vmem:[#allocation4_spill] sm:$0xff] %v3014_v10  ;;  %v2535_v13 = vld [vmem:[%s4225_s2 + $0x7] ss:$8 sm:$0x3]  ;;  %v3032_v15 = vrot.slane %v2536_v11, %v3012_v9  ;;  %v3041_v18 = vrot.slane %v2536_v11, %v3014_v10  ;;  %s4287_s23 = smov 17  }
  0x12   : > { %v2533_v14 = vld [vmem:[%s4225_s2 + $0x5] ss:$8 sm:$0x3]  ;;  %v2531_v16 = vld [vmem:[%s4225_s2 + $0x2] ss:$8 sm:$0x3]  ;;  %v3044_v19 = vrot.slane %v2534_v12, %v3012_v9  ;;  %v3047_v20 = vrot.slane %v2535_v13, %v3012_v9  ;;  %v3051_v21 = vrot.slane %v2534_v12, %v3014_v10  ;;  %v3054_v22 = vrot.slane %v2535_v13, %v3014_v10 }
  0x13   : > { %v2636_v3 = vpack.i.bf16 %v529_v2, %v528_v1  ;;  %v2532_v17 = vld [vmem:[%s4225_s2 + $0x3] ss:$8 sm:$0x3]  ;;  %v3057_v23 = vrot.slane %v2533_v14, %v3012_v9  ;;  %v3060_v24 = vrot.slane %v2533_v14, %v3014_v10  ;;  %v540_v25 = vld [vmem:[%s4225_s2] ss:$8 sm:$0x3]  ;;  %v3070_v29 = vrot.slane %v2531_v16, %v3012_v9 }
  0x14   : > { %v2530_v26 = vld [vmem:[%s4225_s2 + $0x1] ss:$8 sm:$0x3]  ;;  %vm602_vm6 = vcmp.lt.s32.totalorder %v3010_v8, 1  ;;  %v3074_v30 = vrot.slane %v2532_v17, %v3012_v9  ;;  %v3077_v35 = vrot.slane %v2531_v16, %v3014_v10  ;;  %v3080_v36 = vrot.slane %v2532_v17, %v3014_v10  ;;  %s4366_s17 = smov 15  }
  0x15   : > { %2637 = vrot.lane.b32.xlu0 %v2636_v3, %s2882_s24  ;;  %2647 = vrot.lane.b32.xlu1 %v2636_v3, %s2883_s25  ;;  %v3083_v37 = vrot.slane %v540_v25, %v3012_v9  ;;  %v3086_v38 = vrot.slane %v2530_v26, %v3012_v9  ;;  %vm537_vm7 = vcmp.lt.s32.totalorder %v3010_v8, 17  ;;  %vm558_vm8 = vcmp.lt.s32.totalorder %v3010_v8, 16 }
  0x16   : > { %v3101_v47 = vrot.slane %v540_v25, %v3014_v10  ;;  %v3104_v48 = vrot.slane %v2530_v26, %v3014_v10 }
  0x19   : > { %2642 = vrot.lane.b32.xlu0 %v2636_v3, %s2884_s26  ;;  %2652 = vrot.lane.b32.xlu1 %v2636_v3, %s2885_s27 }
  0x1d   : > { %2662 = vrot.lane.b32.xlu1 %v2636_v3, %s4244_s28  ;;  %2657 = vrot.lane.b32.xlu0 %v2636_v3, %s4281_s29  ;;  %s4288_s28 = smov 16  }
  0x21   : > { %2672 = vrot.lane.b32.xlu1 %v2636_v3, %s4240_s30  ;;  %2667 = vrot.lane.b32.xlu0 %v2636_v3, %s4242_s16  ;;  %s4286_s30 = smov 1   ;;  %s2581_s16 = sshll.u32 %s4372_s19, 8 }
  0x22   : > { %s3347_s20 = scalar_lea.vmem %s4224_s1, %s2581_s16 }
  0x23   : > { %v1166_v8 = vld [vmem:[%s3347_s20 + $0xf0] sm:$0xff]  ;;  %v1164_v9 = vld [vmem:[%s3347_s20 + $0xe0] sm:$0xff] }
  0x25   : > { %721 = vperm.xlu0 %2676, %v718_v5  }
  0x87   : > { %v2638_v27 = vpop.permute.xlu0 %2637  ;;  %v2648_v28 = vpop.permute.xlu1 %2647 }
  0x88   : > { %v2640_v31 = vunpack.i.h.bf16 %v2638_v27  ;;  %v2639_v32 = vunpack.i.l.bf16 %v2638_v27  ;;  %v2650_v33 = vunpack.i.h.bf16 %v2648_v28  ;;  %v2649_v34 = vunpack.i.l.bf16 %v2648_v28 }
  0x8a   : > { %v692_v39 = vsel %vm690_vm0, %v2640_v31, %v2639_v32  ;;  %v691_v40 = vsel %vm690_vm0, %v2639_v32, %v2640_v31  ;;  %v670_v41 = vsel %vm668_vm2, %v2650_v33, %v2649_v34  ;;  %v669_v42 = vsel %vm668_vm2, %v2649_v34, %v2650_v33 }
  0x8b   : > { %v2643_v43 = vpop.permute.xlu0 %2642  ;;  %v2653_v44 = vpop.permute.xlu1 %2652  ;;  %v707_v45 = vmul.f32 %v3032_v15, %v692_v39  ;;  %v706_v46 = vmul.f32 %v3041_v18, %v691_v40  ;;  %v685_v55 = vmul.f32 %v3047_v20, %v670_v41  ;;  %v684_v56 = vmul.f32 %v3054_v22, %v669_v42 }
  0x8c   : > { %v2645_v49 = vunpack.i.h.bf16 %v2643_v43  ;;  %v2644_v50 = vunpack.i.l.bf16 %v2643_v43  ;;  %v2655_v51 = vunpack.i.h.bf16 %v2653_v44  ;;  %v2654_v52 = vunpack.i.l.bf16 %v2653_v44 }
  0x8d   : > { %v717_v53 = vpack.c.bf16 %v707_v45, %v707_v45  ;;  %v716_v54 = vpack.c.bf16 %v706_v46, %v706_v46 }
  0x8e   : > { %v648_v57 = vsel %vm646_vm1, %v2645_v49, %v2644_v50  ;;  %v647_v58 = vsel %vm646_vm1, %v2644_v50, %v2645_v49  ;;  %v626_v59 = vsel %vm624_vm4, %v2655_v51, %v2654_v52  ;;  %v625_v60 = vsel %vm624_vm4, %v2654_v52, %v2655_v51 }
  0x8f   : > { %2537 = vmatprep.subr.msk.bf16.mxu0 %vm728_vm3, %v717_v53  ;;  %v730_v61 = vsel %vm728_vm3, %v716_v54, 0  ;;  %v2663_v62 = vpop.permute.xlu1 %2662  ;;  %v2658_v63 = vpop.permute.xlu0 %2657  ;;  %v663_v3 = vmul.f32 %v3044_v19, %v648_v57  ;;  %v662_v5 = vmul.f32 %v3051_v21, %v647_v58  ;;  %v641_v6 = vmul.f32 %v3057_v23, %v626_v59  ;;  %v530_v59 = vld [vmem:[%s4227_s4] sm:$0xf] }
  0x90   : > { %742 = vmatpush1.bf16.msra.mxu0 %v730_v61  ;;  %v2665_v7 = vunpack.i.h.bf16 %v2663_v62  ;;  %v2664_v11 = vunpack.i.l.bf16 %v2663_v62  ;;  %v2660_v12 = vunpack.i.h.bf16 %v2658_v63  ;;  %v2659_v13 = vunpack.i.l.bf16 %v2658_v63 }
  0x91   : > { %v715_v14 = vpack.c.bf16 %v685_v55, %v663_v3  ;;  %v714_v16 = vpack.c.bf16 %v684_v56, %v662_v5  ;;  %v713_v17 = vpack.c.bf16 %v641_v6, %v529_v2  ;;  %v640_v25 = vmul.f32 %v3060_v24, %v625_v60 }
  0x92   : > { %v581_v26 = vsel %vm580_vm5, %v2659_v13, %v2660_v12  ;;  %v603_v27 = vsel %vm602_vm6, %v2664_v11, %v2665_v7  ;;  %v582_v28 = vsel %vm580_vm5, %v2660_v12, %v2659_v13  ;;  %v604_v31 = vsel %vm602_vm6, %v2665_v7, %v2664_v11  ;;  %v853_v12 = vld [vmem:[%s4230_s7] sm:$0xff] }
  0x93   : > { %743 = vmatprep.subr.bf16.mxu0 %v715_v14  ;;  %v2673_v32 = vpop.permute.xlu1 %2672  ;;  %v2668_v33 = vpop.permute.xlu0 %2667  ;;  %v712_v2 = vpack.c.bf16 %v640_v25, %v528_v1  ;;  %v597_v34 = vmul.f32 %v3070_v29, %v581_v26  ;;  %v619_v39 = vmul.f32 %v3074_v30, %v603_v27  ;;  %v596_v40 = vmul.f32 %v3077_v35, %v582_v28  ;;  %v910_v13 = vld [vmem:[%s4232_s9] sm:$0xff] }
  0x94   : > { %744 = vmatpush1.bf16.msra.mxu0 %v714_v16  ;;  %v2675_v41 = vunpack.i.h.bf16 %v2673_v32  ;;  %v2674_v42 = vunpack.i.l.bf16 %v2673_v32  ;;  %v2670_v43 = vunpack.i.h.bf16 %v2668_v33  ;;  %v2669_v44 = vunpack.i.l.bf16 %v2668_v33 }
  0x95   : > { %745 = vmatprep.subr.bf16.mxu0 %v713_v17  ;;  %v711_v45 = vpack.c.bf16 %v619_v39, %v597_v34  ;;  %v618_v46 = vmul.f32 %v3080_v36, %v604_v31 }
  0x96   : > { %v538_v49 = vsel %vm537_vm7, %v2669_v44, %v2670_v43  ;;  %v559_v1 = vsel %vm558_vm8, %v2674_v42, %v2675_v41  ;;  %v539_v50 = vsel %vm537_vm7, %v2670_v43, %v2669_v44  ;;  %v560_v51 = vsel %vm558_vm8, %v2675_v41, %v2674_v42 }
  0x97   : > { %v553_v52 = vmul.f32 %v3083_v37, %v538_v49  ;;  %v575_v53 = vmul.f32 %v3086_v38, %v559_v1  ;;  %v710_v54 = vpack.c.bf16 %v618_v46, %v596_v40  ;;  %v552_v55 = vmul.f32 %v3101_v47, %v539_v50 }
  0x98   : > { %746 = vmatpush1.bf16.msra.mxu0 %v712_v2  ;;  %v574_v56 = vmul.f32 %v3104_v48, %v560_v51 }
  0x99   : > { %747 = vmatprep.subr.bf16.mxu0 %v711_v45  ;;  %v709_v57 = vpack.c.bf16 %v575_v53, %v553_v52 }
  0x9a   : > { %v708_v58 = vpack.c.bf16 %v574_v56, %v552_v55 }
  0x9c   : > { %748 = vmatpush1.bf16.msra.mxu0 %v710_v54 }
  0x9d   : > { %749 = vmatprep.subr.bf16.mxu0 %v709_v57 }
  0xa0   : > { %750 = vmatpush1.bf16.msra.mxu0 %v708_v58  ;;  %v722_v60 = vpop.permute.xlu0 %721 }
  0xa3   : > { %2538 = vmatmul.mubr.msk.bf16.vlgmr.msra.gmra.mxu0 %vm724_vm9, %v530_v59 }
  0xa4   : > { %1318 = vmatprep.mubr.bf16.mxu0 %v4246_v4 }
 0x163   : > { %v769_v61 = vpop.f32.mrf.mxu0 }
 0x164   : > { %v770_v62 = vadd.f32 %v769_v61, %v722_v60 }
 0x165   : > { %v771_v63 = vpop.f32.mrf.mxu0 }
 0x166   : > { %v3155_v3 = vmax.f32 %v770_v62, 0.0  ;;  %v772_v5 = vadd.f32 %v771_v63, %v722_v60 }
 0x167   : > { %v773_v6 = vpop.f32.mrf.mxu0 }
 0x168   : > { %819 = vrot.lane.b32.xlu0 %v3155_v3, %s2884_s26  ;;  %835 = vrot.lane.b32.xlu1 %v3155_v3, %s2882_s24  ;;  %v777_v11 = vmax.f32 %v772_v5, 0.0 }
 0x169   : > { %v774_v7 = vpop.f32.mrf.mxu0 }
 0x16c   : > { %827 = vrot.lane.b32.xlu0 %v3155_v3, %s2883_s25  ;;  %837 = vrot.lane.b32.xlu1 %v777_v11, %s2882_s24 }
 0x170   : > { %811 = vrot.lane.b32.xlu0 %v3155_v3, %s2885_s27  ;;  %821 = vrot.lane.b32.xlu1 %v777_v11, %s2884_s26 }
 0x174   : > { %795 = vrot.lane.b32.xlu0 %v3155_v3, %s4281_s29  ;;  %829 = vrot.lane.b32.xlu1 %v777_v11, %s2883_s25 }
 0x178   : > { %803 = vrot.lane.b32.xlu0 %v3155_v3, %s4286_s30  ;;  %813 = vrot.lane.b32.xlu1 %v777_v11, %s2885_s27 }
 0x17c   : > { %779 = vrot.lane.b32.xlu0 %v3155_v3, %s4287_s23  ;;  %797 = vrot.lane.b32.xlu1 %v777_v11, %s4281_s29 }
 0x180   : > { %787 = vrot.lane.b32.xlu0 %v3155_v3, %s4288_s28  ;;  %805 = vrot.lane.b32.xlu1 %v777_v11, %s4286_s30 }
 0x184   : > { %856 = vperm.xlu0 %2676, %v853_v12   ;;  %781 = vrot.lane.b32.xlu1 %v777_v11, %s4287_s23 }
 0x188   : > { %789 = vrot.lane.b32.xlu1 %v777_v11, %s4288_s28 }
 0x18c   : > { %913 = vperm.xlu1 %2677, %v910_v13  }
 0x1da   : > { %v820_v14 = vpop.permute.xlu0 %819  ;;  %v836_v16 = vpop.permute.xlu1 %835 }
 0x1de   : > { %v828_v17 = vpop.permute.xlu0 %827  ;;  %v838_v25 = vpop.permute.xlu1 %837 }
 0x1df   : > { %v839_v26 = vsel %vm690_vm0, %v836_v16, %v838_v25  ;;  %v840_v27 = vsel %vm690_vm0, %v838_v25, %v836_v16 }
 0x1e0   : > { %v842_v28 = vmul.f32 %v840_v27, %v3032_v15  ;;  %v841_v31 = vmul.f32 %v839_v26, %v3041_v18  ;;  %v2542_v26 = vcombine.high %v2987_v0, %v2987_v0  ;;  %v2541_v27 = vcombine.low %v2987_v0, %v2987_v0 }
 0x1e2   : > { %v812_v32 = vpop.permute.xlu0 %811  ;;  %v822_v33 = vpop.permute.xlu1 %821  ;;  %v852_v2 = vpack.c.bf16 %v842_v28, %v842_v28  ;;  %v851_v34 = vpack.c.bf16 %v841_v31, %v841_v31 }
 0x1e3   : > { %v823_v40 = vsel %vm646_vm1, %v820_v14, %v822_v33  ;;  %v824_v41 = vsel %vm646_vm1, %v822_v33, %v820_v14 }
 0x1e4   : > { %2539 = vmatprep.subr.msk.bf16.mxu1 %vm728_vm3, %v852_v2  ;;  %v863_v39 = vsel %vm728_vm3, %v851_v34, 0  ;;  %v825_v43 = vmul.f32 %v823_v40, %v3051_v21  ;;  %v826_v44 = vmul.f32 %v824_v41, %v3044_v19 }
 0x1e5   : > { %875 = vmatpush1.bf16.msra.mxu1 %v863_v39 }
 0x1e6   : > { %v830_v42 = vpop.permute.xlu1 %829  ;;  %v796_v45 = vpop.permute.xlu0 %795 }
 0x1e7   : > { %v831_v15 = vsel %vm668_vm2, %v828_v17, %v830_v42  ;;  %v832_v18 = vsel %vm668_vm2, %v830_v42, %v828_v17 }
 0x1e8   : > { %v833_v46 = vmul.f32 %v831_v15, %v3054_v22  ;;  %v834_v49 = vmul.f32 %v832_v18, %v3047_v20 }
 0x1ea   : > { %v814_v1 = vpop.permute.xlu1 %813  ;;  %v850_v50 = vpack.c.bf16 %v834_v49, %v826_v44  ;;  %v849_v51 = vpack.c.bf16 %v833_v46, %v825_v43  ;;  %v804_v19 = vpop.permute.xlu0 %803 }
 0x1eb   : > { %v815_v52 = vsel %vm624_vm4, %v812_v32, %v814_v1  ;;  %v816_v53 = vsel %vm624_vm4, %v814_v1, %v812_v32 }
 0x1ec   : > { %v817_v54 = vmul.f32 %v815_v52, %v3060_v24  ;;  %v818_v21 = vmul.f32 %v816_v53, %v3057_v23  ;;  %876 = vmatprep.subr.bf16.mxu1 %v850_v50 }
 0x1ed   : > { %877 = vmatpush1.bf16.msra.mxu1 %v849_v51  ;;  %v2680_v51 = vld [vmem:[%s4233_s10] sm:$0xff]  }
 0x1ee   : > { %v798_v55 = vpop.permute.xlu1 %797  ;;  %v848_v22 = vpack.c.bf16 %v818_v21, %v777_v11  ;;  %v847_v20 = vpack.c.bf16 %v817_v54, %v3155_v3  ;;  %v780_v59 = vpop.permute.xlu0 %779 }
 0x1ef   : > { %v799_v56 = vsel %vm580_vm5, %v796_v45, %v798_v55  ;;  %v800_v57 = vsel %vm580_vm5, %v798_v55, %v796_v45 }
 0x1f0   : > { %878 = vmatprep.subr.bf16.mxu1 %v848_v22  ;;  %v801_v60 = vmul.f32 %v800_v57, %v3077_v35  ;;  %v802_v61 = vmul.f32 %v799_v56, %v3070_v29 }
 0x1f1   : > { %879 = vmatpush1.bf16.msra.mxu1 %v847_v20 }
 0x1f2   : > { %v806_v58 = vpop.permute.xlu1 %805  ;;  %v788_v12 = vpop.permute.xlu0 %787 }
 0x1f3   : > { %v807_v24 = vsel %vm602_vm6, %v804_v19, %v806_v58  ;;  %v808_v23 = vsel %vm602_vm6, %v806_v58, %v804_v19 }
 0x1f4   : > { %v809_v62 = vmul.f32 %v808_v23, %v3080_v36  ;;  %v810_v63 = vmul.f32 %v807_v24, %v3074_v30 }
 0x1f6   : > { %v782_v3 = vpop.permute.xlu1 %781  ;;  %v846_v5 = vpack.c.bf16 %v810_v63, %v802_v61  ;;  %v845_v6 = vpack.c.bf16 %v809_v62, %v801_v60 }
 0x1f7   : > { %v783_v7 = vsel %vm537_vm7, %v780_v59, %v782_v3  ;;  %v784_v11 = vsel %vm537_vm7, %v782_v3, %v780_v59 }
 0x1f8   : > { %880 = vmatprep.subr.bf16.mxu1 %v846_v5  ;;  %v785_v30 = vmul.f32 %v784_v11, %v3101_v47  ;;  %v786_v36 = vmul.f32 %v783_v7, %v3083_v37  ;;  %v778_v47 = vld [vmem:[%s4229_s6] sm:$0xf]  ;;  %v926_v37 = vsel %vm728_vm3, %v2541_v27, 0 }
 0x1f9   : > { %881 = vmatpush1.bf16.msra.mxu1 %v845_v6 }
 0x1fa   : > { %v790_v13 = vpop.permute.xlu1 %789 }
 0x1fb   : > { %v791_v29 = vsel %vm558_vm8, %v788_v12, %v790_v13  ;;  %v792_v35 = vsel %vm558_vm8, %v790_v13, %v788_v12 }
 0x1fc   : > { %v793_v14 = vmul.f32 %v792_v35, %v3104_v48  ;;  %v794_v16 = vmul.f32 %v791_v29, %v3086_v38  ;;  %v909_v38 = vld [vmem:[%s4231_s8] sm:$0xf] }
 0x1fe   : > { %v844_v17 = vpack.c.bf16 %v794_v16, %v786_v36  ;;  %v843_v25 = vpack.c.bf16 %v793_v14, %v785_v30 }
 0x1ff   : > { %v857_v33 = vpop.permute.xlu0 %856 }
 0x200   : > { %882 = vmatprep.subr.bf16.mxu1 %v844_v17 }
 0x201   : > { %883 = vmatpush1.bf16.msra.mxu1 %v843_v25 }
 0x202   : > { %2543 = vmatprep.subr.msk.bf16.mxu1 %vm728_vm3, %v2542_v26 }
 0x204   : > { %2540 = vmatmul.mubr.msk.bf16.vlgmr.msra.gmra.mxu1 %vm724_vm9, %v778_v47 }
 0x205   : > { %946 = vmatpush1.bf16.msra.mxu1 %v926_v37  ;;  %963 = vmatprep.mubr.bf16.mxu1 %v4246_v4 }
 0x207   : > { %v914_v32 = vpop.permute.xlu1 %913 }
 0x20c   : > { %2544 = vmatmul.mubr.msk.bf16.vlgmr.msra.gmra.mxu1 %vm921_vm10, %v909_v38 }
 0x20d   : > { %1033 = vmatprep.mubr.bf16.mxu1 %v4246_v4 }
 0x2c4   : > { %v902_v0 = vpop.f32.mrf.mxu1 }
 0x2c5   : > { %v903_v34 = vadd.f32 %v902_v0, %v857_v33 }
 0x2c6   : > { %v904_v48 = vpop.f32.mrf.mxu1 }
 0x2c7   : > { %v905_v41 = vadd.f32 %v904_v48, %v857_v33 }
 0x2c8   : > { %v906_v28 = vpop.f32.mrf.mxu1 }
 0x2ca   : > { %v907_v31 = vpop.f32.mrf.mxu1 }
 0x2cc   : > { %v965_v2 = vpop.f32.mrf.mxu1 }
 0x2cd   : > { %v966_v39 = vadd.f32 %v965_v2, %v914_v32 }
 0x2ce   : > { %v967_v40 = vpop.f32.mrf.mxu1 }
 0x2cf   : > { %v972_v42 = vadd.f32 %v966_v39, %v903_v34  ;;  %v968_v15 = vadd.f32 %v967_v40, %v914_v32 }
 0x2d0   : > { %v969_v18 = vpop.f32.mrf.mxu1 }
 0x2d1   : > { %v3254_v43 = vmax.f32 %v972_v42, 0.0  ;;  %v973_v44 = vadd.f32 %v968_v15, %v905_v41 }
 0x2d2   : > { %v970_v45 = vpop.f32.mrf.mxu1 }
 0x2d3   : > { %4289 = vst [vmem:[#allocation5_spill] sm:$0xff] %v3254_v43  ;;  %v3256_v46 = vmax.f32 %v973_v44, 0.0  ;;  %v976_v49 = vpack.c.bf16 %v3254_v43, %v3254_v43 }
 0x2d5   : > { %4290 = vst [vmem:[#allocation6_spill] sm:$0xff] %v3256_v46  ;;  %v977_v1 = vpack.c.bf16 %v3256_v46, %v3256_v46  ;;  %v996_v50 = vsel %vm728_vm3, %v976_v49, 0  ;;  %v1228_v46 = vunpack.c.l.bf16 %v1166_v8 }
 0x2d7   : > { %2547 = vmatprep.subr.msk.bf16.mxu1 %vm728_vm3, %v977_v1 }
 0x2d8   : > { %1016 = vmatpush1.bf16.msra.mxu1 %v996_v50 }
 0x2db   : > { %2548 = vmatmul.mubr.msk.bf16.vlgmr.msra.gmra.mxu1 %vm921_vm10, %v2680_v51 }
 0x2dc   : > { %1043 = vmatprep.mubr.bf16.mxu1 %v4246_v4 }
 0x39b   : > { %v1035_v52 = vpop.f32.mrf.mxu1 }
 0x39c   : > { %1056 = vxpose.xlu0.b32.start.end [1/1] (short) %v1035_v52, 128 }
 0x39d   : > { %v1037_v53 = vpop.f32.mrf.mxu1 }
 0x39e   : > { %1088 = vxpose.xlu1.b32.start.end [1/1] (short) %v1037_v53, 128 }
 0x39f   : > { %v1039_v54 = vpop.f32.mrf.mxu1 }
 0x3a0   : > { %v1052_v21 = vpack.c.bf16 %v1039_v54, %v1039_v54 }
 0x3a1   : > { %v1041_v19 = vpop.f32.mrf.mxu1 }
 0x3a2   : > { %v1053_v55 = vpack.c.bf16 %v1041_v19, %v1041_v19  ;;  %v1281_v22 = vsel %vm728_vm3, %v1052_v21, 0 }
 0x3a4   : > { %2550 = vmatprep.subr.msk.bf16.mxu0 %vm728_vm3, %v1053_v55 }
 0x3a5   : > { %1301 = vmatpush1.bf16.msra.mxu0 %v1281_v22 }
 0x418   : > { %v1072_v20 = vpop.trf.xlu0 }
 0x41a   : > { %v1104_v5 = vpop.trf.xlu1 }
 0x41c   : > { %v1073_v56 = vpop.trf.xlu0 }
 0x41d   : > { %v1120_v57 = vpack.c.bf16 %v1073_v56, %v1072_v20 }
 0x41e   : > { %v1105_v11 = vpop.trf.xlu1 }
 0x41f   : > { %2551 = vmatmul.mubr.msk.bf16.vlgmr.msra.gmra.mxu0 %vm921_vm10, %v1120_v57  ;;  %v1128_v0 = vpack.c.bf16 %v1105_v11, %v1104_v5 }
 0x420   : > { %v1074_v58 = vpop.trf.xlu0  ;;  %1328 = vmatprep.mubr.bf16.mxu0 %v4246_v4 }
 0x422   : > { %v1106_v29 = vpop.trf.xlu1 }
 0x424   : > { %v1075_v24 = vpop.trf.xlu0 }
 0x425   : > { %v1121_v23 = vpack.c.bf16 %v1075_v24, %v1074_v58 }
 0x426   : > { %v1107_v14 = vpop.trf.xlu1 }
 0x427   : > { %2552 = vmatmul.mubr.msk.bf16.gmra.mxu0 %vm921_vm10, %v1121_v23  ;;  %v1129_v28 = vpack.c.bf16 %v1107_v14, %v1106_v29 }
 0x428   : > { %v1076_v59 = vpop.trf.xlu0  ;;  %1338 = vmatprep.mubr.bf16.mxu0 %v4246_v4 }
 0x42a   : > { %v1108_v25 = vpop.trf.xlu1 }
 0x42c   : > { %v1077_v60 = vpop.trf.xlu0 }
 0x42d   : > { %v1122_v61 = vpack.c.bf16 %v1077_v60, %v1076_v59 }
 0x42e   : > { %v1109_v47 = vpop.trf.xlu1 }
 0x42f   : > { %2553 = vmatmul.mubr.msk.bf16.gmra.mxu0 %vm921_vm10, %v1122_v61  ;;  %v1130_v32 = vpack.c.bf16 %v1109_v47, %v1108_v25 }
 0x430   : > { %v1078_v62 = vpop.trf.xlu0  ;;  %1348 = vmatprep.mubr.bf16.mxu0 %v4246_v4 }
 0x432   : > { %v1110_v38 = vpop.trf.xlu1 }
 0x434   : > { %v1079_v63 = vpop.trf.xlu0 }
 0x435   : > { %v1123_v3 = vpack.c.bf16 %v1079_v63, %v1078_v62 }
 0x436   : > { %v1111_v48 = vpop.trf.xlu1 }
 0x437   : > { %2554 = vmatmul.mubr.msk.bf16.gmra.mxu0 %vm921_vm10, %v1123_v3  ;;  %v1131_v34 = vpack.c.bf16 %v1111_v48, %v1110_v38  ;;  %v1149_v48 = vld [vmem:[%s3347_s20 + $0x68] sm:$0xff] }
 0x438   : > { %v1080_v6 = vpop.trf.xlu0  ;;  %1358 = vmatprep.mubr.bf16.mxu0 %v4246_v4 }
 0x43a   : > { %v1112_v31 = vpop.trf.xlu1 }
 0x43c   : > { %v1081_v7 = vpop.trf.xlu0 }
 0x43d   : > { %v1124_v12 = vpack.c.bf16 %v1081_v7, %v1080_v6 }
 0x43e   : > { %v1113_v33 = vpop.trf.xlu1 }
 0x43f   : > { %2555 = vmatmul.mubr.msk.bf16.gmra.mxu0 %vm921_vm10, %v1124_v12  ;;  %v1132_v40 = vpack.c.bf16 %v1113_v33, %v1112_v31  ;;  %v1195_v33 = vunpack.c.h.bf16 %v1149_v48 }
 0x440   : > { %v1082_v13 = vpop.trf.xlu0  ;;  %1368 = vmatprep.mubr.bf16.mxu0 %v4246_v4 }
 0x442   : > { %v1114_v2 = vpop.trf.xlu1 }
 0x444   : > { %v1083_v35 = vpop.trf.xlu0 }
 0x445   : > { %v1125_v30 = vpack.c.bf16 %v1083_v35, %v1082_v13  ;;  %v1150_v13 = vld [vmem:[%s3347_s20 + $0x70] sm:$0xff]  ;;  %v1148_v35 = vld [vmem:[%s3347_s20 + $0x60] sm:$0xff] }
 0x446   : > { %v1115_v39 = vpop.trf.xlu1  ;;  %v1192_v25 = vunpack.c.l.bf16 %v1148_v35 }
 0x447   : > { %2556 = vmatmul.mubr.msk.bf16.gmra.mxu0 %vm921_vm10, %v1125_v30  ;;  %v1133_v42 = vpack.c.bf16 %v1115_v39, %v1114_v2  ;;  %v1196_v30 = vunpack.c.l.bf16 %v1150_v13 }
 0x448   : > { %v1084_v36 = vpop.trf.xlu0  ;;  %1378 = vmatprep.mubr.bf16.mxu0 %v4246_v4 }
 0x44a   : > { %v1116_v41 = vpop.trf.xlu1 }
 0x44c   : > { %v1085_v16 = vpop.trf.xlu0 }
 0x44d   : > { %v1126_v17 = vpack.c.bf16 %v1085_v16, %v1084_v36  ;;  %v1197_v36 = vunpack.c.h.bf16 %v1150_v13  ;;  %v1151_v16 = vld [vmem:[%s3347_s20 + $0x78] sm:$0xff] }
 0x44e   : > { %v1117_v15 = vpop.trf.xlu1  ;;  %v1198_v38 = vunpack.c.l.bf16 %v1151_v16 }
 0x44f   : > { %2557 = vmatmul.mubr.msk.bf16.gmra.mxu0 %vm921_vm10, %v1126_v17  ;;  %v1134_v44 = vpack.c.bf16 %v1117_v15, %v1116_v41  ;;  %v1193_v17 = vunpack.c.h.bf16 %v1148_v35  ;;  %v1147_v41 = vld [vmem:[%s3347_s20 + $0x58] sm:$0xff]  ;;  %v1194_v15 = vunpack.c.l.bf16 %v1149_v48 }
 0x450   : > { %v1086_v26 = vpop.trf.xlu0  ;;  %1388 = vmatprep.mubr.bf16.mxu0 %v4246_v4 }
 0x452   : > { %v1118_v18 = vpop.trf.xlu1 }
 0x454   : > { %v1087_v27 = vpop.trf.xlu0 }
 0x455   : > { %v1127_v37 = vpack.c.bf16 %v1087_v27, %v1086_v26  ;;  %v1146_v27 = vld [vmem:[%s3347_s20 + $0x50] sm:$0xff] }
 0x456   : > { %v1119_v45 = vpop.trf.xlu1  ;;  %v1189_v31 = vunpack.c.h.bf16 %v1146_v27 }
 0x457   : > { %2558 = vmatmul.mubr.msk.bf16.gmra.mxu0 %vm921_vm10, %v1127_v37  ;;  %v1135_v49 = vpack.c.bf16 %v1119_v45, %v1118_v18 }
 0x458   : > { %1398 = vmatprep.mubr.bf16.mxu0 %v4246_v4 }
 0x45f   : > { %2559 = vmatmul.mubr.msk.bf16.gmra.mxu0 %vm921_vm10, %v1128_v0  ;;  %v1199_v0 = vunpack.c.h.bf16 %v1151_v16 }
 0x460   : > { %1408 = vmatprep.mubr.bf16.mxu0 %v4246_v4 }
 0x467   : > { %2560 = vmatmul.mubr.msk.bf16.gmra.mxu0 %vm921_vm10, %v1129_v28 }
 0x468   : > { %1418 = vmatprep.mubr.bf16.mxu0 %v4246_v4 }
 0x46f   : > { %2561 = vmatmul.mubr.msk.bf16.gmra.mxu0 %vm921_vm10, %v1130_v32 }
 0x470   : > { %1428 = vmatprep.mubr.bf16.mxu0 %v4246_v4 }
 0x477   : > { %2562 = vmatmul.mubr.msk.bf16.gmra.mxu0 %vm921_vm10, %v1131_v34  ;;  %v1188_v34 = vunpack.c.l.bf16 %v1146_v27 }
 0x478   : > { %1438 = vmatprep.mubr.bf16.mxu0 %v4246_v4 }
 0x47f   : > { %2563 = vmatmul.mubr.msk.bf16.gmra.mxu0 %vm921_vm10, %v1132_v40  ;;  %v1144_v40 = vld [vmem:[%s3347_s20 + $0x40] sm:$0xff] }
 0x480   : > { %1448 = vmatprep.mubr.bf16.mxu0 %v4246_v4  ;;  %v1185_v45 = vunpack.c.h.bf16 %v1144_v40  ;;  %v1184_v16 = vunpack.c.l.bf16 %v1144_v40 }
 0x487   : > { %2564 = vmatmul.mubr.msk.bf16.gmra.mxu0 %vm921_vm10, %v1133_v42 }
 0x488   : > { %1458 = vmatprep.mubr.bf16.mxu0 %v4246_v4 }
 0x48f   : > { %2565 = vmatmul.mubr.msk.bf16.gmra.mxu0 %vm921_vm10, %v1134_v44 }
 0x490   : > { %1468 = vmatprep.mubr.bf16.mxu0 %v4246_v4 }
 0x497   : > { %2566 = vmatmul.mubr.msk.bf16.gmra.mxu0 %vm921_vm10, %v1135_v49  ;;  %v1191_v49 = vunpack.c.h.bf16 %v1147_v41 }
 0x498   : > { %2076 = vmatprep.mubr.bf16.mxu0 %v4246_v4 }
 0x4df   : > { %v3303_v1 = vpop.f32.mrf.mxu0 }
 0x4e1   : > { %v3305_v50 = vpop.f32.mrf.mxu0 }
 0x4e3   : > { %v3307_v51 = vpop.f32.mrf.mxu0 }
 0x4e5   : > { %v3309_v52 = vpop.f32.mrf.mxu0 }
 0x4e7   : > { %v3311_v53 = vpop.f32.mrf.mxu0 }
 0x4e9   : > { %v3313_v54 = vpop.f32.mrf.mxu0 }
 0x4eb   : > { %v3315_v21 = vpop.f32.mrf.mxu0 }
 0x4ed   : > { %v3317_v19 = vpop.f32.mrf.mxu0 }
 0x4ef   : > { %v3319_v55 = vpop.f32.mrf.mxu0 }
 0x4f1   : > { %v3321_v22 = vpop.f32.mrf.mxu0 }
 0x4f3   : > { %v3323_v20 = vpop.f32.mrf.mxu0 }
 0x4f5   : > { %v3325_v56 = vpop.f32.mrf.mxu0 }
 0x4f7   : > { %v3327_v57 = vpop.f32.mrf.mxu0 }
 0x4f9   : > { %v3329_v58 = vpop.f32.mrf.mxu0 }
 0x4fb   : > { %v3331_v24 = vpop.f32.mrf.mxu0 }
 0x4fd   : > { %v3333_v23 = vpop.f32.mrf.mxu0 }
 0x4ff   : > { %v3335_v59 = vpop.f32.mrf.mxu0 }
 0x501   : > { %v1362_v60 = vpop.f32.mrf.mxu0 }
 0x503   : > { %v3337_v61 = vpop.f32.mrf.mxu0 }
 0x505   : > { %v3339_v62 = vpop.f32.mrf.mxu0 }
 0x507   : > { %v1370_v63 = vpop.f32.mrf.mxu0 }
 0x509   : > { %v1372_v3 = vpop.f32.mrf.mxu0 }
 0x50a   : > { %v3372_v13 = vadd.f32 %v1372_v3, %v1189_v31 }
 0x50b   : > { %v3341_v5 = vpop.f32.mrf.mxu0 }
 0x50d   : > { %v1376_v6 = vpop.f32.mrf.mxu0 }
 0x50e   : > { %v3392_v48 = vadd.f32 %v1376_v6, %v1191_v49 }
 0x50f   : > { %v1380_v7 = vpop.f32.mrf.mxu0 }
 0x510   : > { %v3364_v42 = vadd.f32 %v1380_v7, %v1192_v25  ;;  %v3384_v25 = vadd.f32 %v1370_v63, %v1188_v34  ;;  %v3403_v34 = vadd.f32 %v3335_v59, %v1184_v16 }
 0x511   : > { %v1382_v11 = vpop.f32.mrf.mxu0 }
 0x512   : > { %v3358_v32 = vadd.f32 %v1382_v11, %v1193_v17  ;;  %v1145_v17 = vld [vmem:[%s3347_s20 + $0x48] sm:$0xff]  ;;  %v1509_v63 = vmax.f32 %v3384_v25, %v3372_v13 }
 0x513   : > { %v1384_v12 = vpop.f32.mrf.mxu0  ;;  %v1187_v27 = vunpack.c.h.bf16 %v1145_v17 }
 0x514   : > { %v1515_v7 = vmax.f32 %v3364_v42, %v3358_v32  ;;  %v3386_v3 = vadd.f32 %v1384_v12, %v1194_v15  ;;  %v1140_v12 = vld [vmem:[%s3347_s20 + $0x20] sm:$0xff] }
 0x515   : > { %v1386_v29 = vpop.f32.mrf.mxu0 }
 0x516   : > { %v3374_v35 = vadd.f32 %v1386_v29, %v1195_v33 }
 0x517   : > { %v1390_v14 = vpop.f32.mrf.mxu0 }
 0x518   : > { %v3353_v47 = vadd.f32 %v1390_v14, %v1196_v30  ;;  %v1142_v14 = vld [vmem:[%s3347_s20 + $0x30] sm:$0xff] }
 0x519   : > { %v1392_v26 = vpop.f32.mrf.mxu0  ;;  %v1181_v29 = vunpack.c.h.bf16 %v1142_v14  ;;  %v1180_v33 = vunpack.c.l.bf16 %v1142_v14  ;;  %v1141_v14 = vld [vmem:[%s3347_s20 + $0x28] sm:$0xff] }
 0x51a   : > { %v3355_v37 = vadd.f32 %v1392_v26, %v1197_v36  ;;  %v1190_v26 = vunpack.c.l.bf16 %v1147_v41 }
 0x51b   : > { %v1394_v28 = vpop.f32.mrf.mxu0  ;;  %v3411_v15 = vadd.f32 %v3329_v58, %v1181_v29  ;;  %v3425_v16 = vadd.f32 %v3327_v57, %v1180_v33 }
 0x51c   : > { %v1521_v2 = vmax.f32 %v3353_v47, %v3355_v37  ;;  %v3366_v18 = vadd.f32 %v1394_v28, %v1198_v38  ;;  %v1518_v28 = vmax.f32 %v3386_v3, %v3374_v35  ;;  %v3406_v6 = vadd.f32 %v3341_v5, %v1190_v26 }
 0x51d   : > { %v1396_v39 = vpop.f32.mrf.mxu0  ;;  %v1179_v26 = vunpack.c.h.bf16 %v1141_v14 }
 0x51e   : > { %v3368_v44 = vadd.f32 %v1396_v39, %v1199_v0  ;;  %1522 = vmax.xlane.f32.xlu0 %v1521_v2  ;;  %v3390_v0 = vadd.f32 %v1362_v60, %v1185_v45  ;;  %v1143_v2 = vld [vmem:[%s3347_s20 + $0x38] sm:$0xff]  ;;  %v1186_v60 = vunpack.c.l.bf16 %v1145_v17  ;;  %v1177_v39 = vunpack.c.h.bf16 %v1140_v12 }
 0x51f   : > { %v3370_v11 = vpop.f32.mrf.mxu0  ;;  %v1183_v40 = vunpack.c.h.bf16 %v1143_v2  ;;  %v3414_v45 = vadd.f32 %v3339_v62, %v1187_v27  ;;  %v1512_v59 = vmax.f32 %v3406_v6, %v3392_v48  ;;  %v1182_v58 = vunpack.c.l.bf16 %v1143_v2  ;;  %v1139_v2 = vld [vmem:[%s3347_s20 + $0x18] sm:$0xff] }
 0x520   : > { %4291 = vst [vmem:[#allocation7_spill] sm:$0xff] %v3370_v11  ;;  %v1524_v30 = vmax.f32 %v3366_v18, %v3368_v44  ;;  %v1503_v49 = vmax.f32 %v3403_v34, %v3390_v0  ;;  %v3428_v62 = vadd.f32 %v3337_v61, %v1186_v60  ;;  %v3433_v27 = vadd.f32 %v3321_v22, %v1177_v39 }
 0x521   : > { %v3380_v36 = vpop.f32.mrf.mxu0  ;;  %v1178_v22 = vunpack.c.l.bf16 %v1141_v14  ;;  %v3450_v39 = vadd.f32 %v3331_v24, %v1182_v58  ;;  %v1137_v58 = vld [vmem:[%s3347_s20 + $0x8] sm:$0xff] }
 0x522   : > { %4292 = vst [vmem:[#allocation8_spill] sm:$0xff] %v3380_v36  ;;  %1525 = vmax.xlane.f32.xlu1 %v1524_v30  ;;  %1516 = vmax.xlane.f32.xlu0 %v1515_v7  ;;  %v1138_v30 = vld [vmem:[%s3347_s20 + $0x10] sm:$0xff]  ;;  %v1176_v7 = vunpack.c.l.bf16 %v1140_v12  ;;  %4298 = vst [vmem:[#allocation14_spill] sm:$0xff] %v3433_v27  ;;  %v1506_v57 = vmax.f32 %v3428_v62, %v3414_v45  ;;  %v1136_v12 = vld [vmem:[%s3347_s20] sm:$0xff]  ;;  %v1229_v36 = vunpack.c.h.bf16 %v1166_v8 }
 0x523   : > { %v3388_v38 = vpop.f32.mrf.mxu0  ;;  %v1173_v17 = vunpack.c.h.bf16 %v1138_v30  ;;  %v1172_v33 = vunpack.c.l.bf16 %v1138_v30  ;;  %v3458_v30 = vadd.f32 %v3325_v56, %v1179_v26  ;;  %v1168_v14 = vunpack.c.l.bf16 %v1136_v12 }
 0x524   : > { %4293 = vst [vmem:[#allocation9_spill] sm:$0xff] %v3388_v38  ;;  %v3447_v60 = vadd.f32 %v3319_v55, %v1176_v7  ;;  %v1171_v56 = vunpack.c.h.bf16 %v1137_v58  ;;  %v1224_v38 = vunpack.c.l.bf16 %v1164_v9 }
 0x525   : > { %v3398_v31 = vpop.f32.mrf.mxu0  ;;  %4302 = vst [vmem:[#allocation18_spill] sm:$0xff] %v3458_v30 }
 0x526   : > { %4294 = vst [vmem:[#allocation10_spill] sm:$0xff] %v3398_v31  ;;  %1519 = vmax.xlane.f32.xlu0 %v1518_v28  ;;  %1510 = vmax.xlane.f32.xlu1 %v1509_v63  ;;  %v3436_v28 = vadd.f32 %v3333_v23, %v1183_v40  ;;  %v1497_v63 = vmax.f32 %v3425_v16, %v3411_v15  ;;  %4300 = vst [vmem:[#allocation16_spill] sm:$0xff] %v3447_v60  ;;  %v1169_v23 = vunpack.c.h.bf16 %v1136_v12  ;;  %v1162_v31 = vld [vmem:[%s3347_s20 + $0xd0] sm:$0xff] }
 0x527   : > { %v3408_v41 = vpop.f32.mrf.mxu0  ;;  %v1175_v40 = vunpack.c.h.bf16 %v1139_v2  ;;  %v1491_v7 = vmax.f32 %v3447_v60, %v3433_v27 }
 0x528   : > { %4295 = vst [vmem:[#allocation11_spill] sm:$0xff] %v3408_v41  ;;  %v1500_v55 = vmax.f32 %v3450_v39, %v3436_v28  ;;  %v3476_v26 = vadd.f32 %v3305_v50, %v1169_v23 }
 0x529   : > { %v3420_v5 = vpop.f32.mrf.mxu0  ;;  %v3479_v4 = vadd.f32 %v3317_v19, %v1175_v40  ;;  %v3496_v19 = vadd.f32 %v3309_v52, %v1171_v56 }
 0x52a   : > { %4296 = vst [vmem:[#allocation12_spill] sm:$0xff] %v3420_v5  ;;  %1513 = vmax.xlane.f32.xlu0 %v1512_v59  ;;  %1504 = vmax.xlane.f32.xlu1 %v1503_v49  ;;  %v3455_v49 = vadd.f32 %v3313_v54, %v1173_v17  ;;  %v3471_v54 = vadd.f32 %v3323_v20, %v1178_v22  ;;  %4305 = vst [vmem:[#allocation21_spill] sm:$0xff] %v3476_v26 }
 0x52b   : > { %v3430_v29 = vpop.f32.mrf.mxu0  ;;  %4306 = vst [vmem:[#allocation22_spill] sm:$0xff] %v3479_v4  ;;  %v3488_v20 = vadd.f32 %v3303_v1, %v1168_v14  ;;  %4310 = vst [vmem:[#allocation26_spill] sm:$0xff] %v3496_v19 }
 0x52c   : > { %4297 = vst [vmem:[#allocation13_spill] sm:$0xff] %v3430_v29  ;;  %4301 = vst [vmem:[#allocation17_spill] sm:$0xff] %v3455_v49  ;;  %v1494_v12 = vmax.f32 %v3471_v54, %v3458_v30  ;;  %v1163_v30 = vld [vmem:[%s3347_s20 + $0xd8] sm:$0xff] }
 0x52d   : > { %v3442_v61 = vpop.f32.mrf.mxu0  ;;  %4304 = vst [vmem:[#allocation20_spill] sm:$0xff] %v3471_v54  ;;  %4308 = vst [vmem:[#allocation24_spill] sm:$0xff] %v3488_v20  ;;  %v1479_v40 = vmax.f32 %v3488_v20, %v3476_v26 }
 0x52e   : > { %4299 = vst [vmem:[#allocation15_spill] sm:$0xff] %v3442_v61  ;;  %1507 = vmax.xlane.f32.xlu0 %v1506_v57  ;;  %1498 = vmax.xlane.f32.xlu1 %v1497_v63  ;;  %v3468_v57 = vadd.f32 %v3311_v53, %v1172_v33  ;;  %v1174_v63 = vunpack.c.l.bf16 %v1139_v2  ;;  %v1170_v2 = vunpack.c.l.bf16 %v1137_v58  ;;  %v1160_v61 = vld [vmem:[%s3347_s20 + $0xc0] sm:$0xff] }
 0x52f   : > { %v3452_v59 = vpop.f32.mrf.mxu0  ;;  %v1216_v27 = vunpack.c.l.bf16 %v1160_v61 }
 0x530   : > { %4303 = vst [vmem:[#allocation19_spill] sm:$0xff] %v3468_v57  ;;  %v1485_v53 = vmax.f32 %v3468_v57, %v3455_v49  ;;  %v3491_v22 = vadd.f32 %v3315_v21, %v1174_v63  ;;  %v3505_v1 = vadd.f32 %v3307_v51, %v1170_v2 }
 0x531   : > { %v3464_v24 = vpop.f32.mrf.mxu0 }
 0x532   : > { %1501 = vmax.xlane.f32.xlu0 %v1500_v55  ;;  %1492 = vmax.xlane.f32.xlu1 %v1491_v7  ;;  %4309 = vst [vmem:[#allocation25_spill] sm:$0xff] %v3491_v22  ;;  %v1488_v23 = vmax.f32 %v3491_v22, %v3479_v4  ;;  %4311 = vst [vmem:[#allocation27_spill] sm:$0xff] %v3505_v1  ;;  %v1482_v52 = vmax.f32 %v3505_v1, %v3496_v19  ;;  %v1225_v19 = vunpack.c.h.bf16 %v1164_v9  ;;  %v1165_v1 = vld [vmem:[%s3347_s20 + $0xe8] sm:$0xff] }
 0x533   : > { %v3473_v17 = vpop.f32.mrf.mxu0  ;;  %v1220_v4 = vunpack.c.l.bf16 %v1162_v31  ;;  %v1221_v22 = vunpack.c.h.bf16 %v1162_v31  ;;  %v1226_v29 = vunpack.c.l.bf16 %v1165_v1  ;;  %v1227_v49 = vunpack.c.h.bf16 %v1165_v1 }
 0x535   : > { %v3485_v33 = vpop.f32.mrf.mxu0 }
 0x536   : > { %4307 = vst [vmem:[#allocation23_spill] sm:$0xff] %v3485_v33  ;;  %1495 = vmax.xlane.f32.xlu0 %v1494_v12  ;;  %1486 = vmax.xlane.f32.xlu1 %v1485_v53  ;;  %v1222_v33 = vunpack.c.l.bf16 %v1163_v30 }
 0x537   : > { %v3493_v50 = vpop.f32.mrf.mxu0 }
 0x539   : > { %v3502_v55 = vpop.f32.mrf.mxu0 }
 0x53a   : > { %1489 = vmax.xlane.f32.xlu0 %v1488_v23  ;;  %1480 = vmax.xlane.f32.xlu1 %v1479_v40 }
 0x53b   : > { %v3507_v21 = vpop.f32.mrf.mxu0 }
 0x53d   : > { %v3511_v7 = vpop.f32.mrf.mxu0 }
 0x53e   : > { %1483 = vmax.xlane.f32.xlu0 %v1482_v52  ;;  %v1167_v52 = vld [vmem:[%s3347_s20 + $0xf8] sm:$0xff] }
 0x53f   : > { %v1440_v14 = vpop.f32.mrf.mxu0  ;;  %v1230_v20 = vunpack.c.l.bf16 %v1167_v52  ;;  %v1231_v9 = vunpack.c.h.bf16 %v1167_v52 }
 0x541   : > { %v1442_v58 = vpop.f32.mrf.mxu0 }
 0x543   : > { %v1444_v63 = vpop.f32.mrf.mxu0 }
 0x545   : > { %v1446_v56 = vpop.f32.mrf.mxu0 }
 0x547   : > { %v1450_v51 = vpop.f32.mrf.mxu0 }
 0x548   : > { %v3532_v60 = vadd.f32 %v1450_v51, %v1220_v4 }
 0x549   : > { %v1452_v12 = vpop.f32.mrf.mxu0 }
 0x54a   : > { %v3534_v1 = vadd.f32 %v1452_v12, %v1221_v22 }
 0x54b   : > { %v1454_v53 = vpop.f32.mrf.mxu0 }
 0x54c   : > { %v3551_v51 = vadd.f32 %v1454_v53, %v1222_v33 }
 0x54d   : > { %v1456_v2 = vpop.f32.mrf.mxu0 }
 0x54f   : > { %v1460_v23 = vpop.f32.mrf.mxu0 }
 0x550   : > { %v3522_v5 = vadd.f32 %v1460_v23, %v1224_v38  ;;  %v1223_v38 = vunpack.c.h.bf16 %v1163_v30 }
 0x551   : > { %v1462_v40 = vpop.f32.mrf.mxu0 }
 0x552   : > { %v3524_v41 = vadd.f32 %v1462_v40, %v1225_v19  ;;  %v1161_v19 = vld [vmem:[%s3347_s20 + $0xc8] sm:$0xff] }
 0x553   : > { %v1464_v10 = vpop.f32.mrf.mxu0  ;;  %v1218_v30 = vunpack.c.l.bf16 %v1161_v19 }
 0x554   : > { %v3537_v40 = vadd.f32 %v1464_v10, %v1226_v29  ;;  %v1219_v10 = vunpack.c.h.bf16 %v1161_v19  ;;  %v3553_v29 = vadd.f32 %v1456_v2, %v1223_v38 }
 0x555   : > { %v1466_v43 = vpop.f32.mrf.mxu0  ;;  %v3559_v12 = vadd.f32 %v1444_v63, %v1218_v30 }
 0x556   : > { %v1560_v33 = vmax.f32 %v3551_v51, %v3553_v29 }
 0x557   : > { %v1470_v11 = vpop.f32.mrf.mxu0 }
 0x558   : > { %v3518_v26 = vadd.f32 %v1470_v11, %v1228_v46  ;;  %v1217_v46 = vunpack.c.h.bf16 %v1160_v61  ;;  %v1563_v61 = vmax.f32 %v3522_v5, %v3524_v41 }
 0x559   : > { %v1472_v57 = vpop.f32.mrf.mxu0 }
 0x55a   : > { %v3526_v54 = vadd.f32 %v1472_v57, %v1229_v36  ;;  %v3539_v36 = vadd.f32 %v1466_v43, %v1227_v49  ;;  %v3549_v22 = vadd.f32 %v1442_v58, %v1217_v46  ;;  %v1557_v49 = vmax.f32 %v3532_v60, %v3534_v1 }
 0x55b   : > { %v1474_v8 = vpop.f32.mrf.mxu0 }
 0x55c   : > { %v3528_v11 = vadd.f32 %v1474_v8, %v1230_v20  ;;  %v1569_v31 = vmax.f32 %v3518_v26, %v3526_v54  ;;  %v3547_v20 = vadd.f32 %v1440_v14, %v1216_v27  ;;  %v1566_v43 = vmax.f32 %v3537_v40, %v3539_v36 }
 0x55d   : > { %v1476_v23 = vpop.f32.mrf.mxu0  ;;  %v3561_v27 = vadd.f32 %v1446_v56, %v1219_v10 }
 0x55e   : > { %v3541_v57 = vadd.f32 %v1476_v23, %v1231_v9  ;;  %1570 = vmax.xlane.f32.xlu1 %v1569_v31  ;;  %v1551_v14 = vmax.f32 %v3547_v20, %v3549_v22 }
 0x55f   : > { %v1554_v58 = vmax.f32 %v3559_v12, %v3561_v27 }
 0x560   : > { %v1572_v4 = vmax.f32 %v3528_v11, %v3541_v57 }
 0x562   : > { %1573 = vmax.xlane.f32.xlu0 %v1572_v4  ;;  %1564 = vmax.xlane.f32.xlu1 %v1563_v61 }
 0x566   : > { %1567 = vmax.xlane.f32.xlu0 %v1566_v43  ;;  %1558 = vmax.xlane.f32.xlu1 %v1557_v49 }
 0x56a   : > { %1561 = vmax.xlane.f32.xlu0 %v1560_v33  ;;  %1552 = vmax.xlane.f32.xlu1 %v1551_v14 }
 0x56e   : > { %1555 = vmax.xlane.f32.xlu0 %v1554_v58 }
 0x5a7   : > { %v1523_v53 = vpop.xlane.xlu0 %1522 }
 0x5a8   : > { %v1603_v63 = vsub.f32 %v3353_v47, %v1523_v53  ;;  %v1604_v56 = vsub.f32 %v3355_v37, %v1523_v53 }
 0x5aa   : > { %v1695_v2 = vmul.f32 1.442695, %v1603_v63  ;;  %v1697_v52 = vmul.f32 1.442695, %v1604_v56  ;;  %v1159_v63 = vld [vmem:[%s3347_s20 + $0xb8] sm:$0xff] }
 0x5ab   : > { %v1526_v9 = vpop.xlane.xlu1 %1525  ;;  %v1517_v8 = vpop.xlane.xlu0 %1516 }
 0x5ac   : > { %2682 = vpow2.f32 %v1695_v2  ;;  %v1605_v46 = vsub.f32 %v3366_v18, %v1526_v9  ;;  %v1606_v31 = vsub.f32 %v3368_v44, %v1526_v9  ;;  %v1599_v38 = vsub.f32 %v3364_v42, %v1517_v8  ;;  %v1158_v18 = vld [vmem:[%s3347_s20 + $0xb0] sm:$0xff] }
 0x5ad   : > { %2684 = vpow2.f32 %v1697_v52  ;;  %v1600_v23 = vsub.f32 %v3358_v32, %v1517_v8  ;;  %v1212_v58 = vunpack.c.l.bf16 %v1158_v18  ;;  %v1213_v53 = vunpack.c.h.bf16 %v1158_v18 }
 0x5ae   : > { %v1699_v19 = vmul.f32 1.442695, %v1605_v46  ;;  %v1701_v61 = vmul.f32 1.442695, %v1606_v31  ;;  %v1687_v47 = vmul.f32 1.442695, %v1599_v38  ;;  %v1214_v8 = vunpack.c.l.bf16 %v1159_v63 }
 0x5af   : > { %v1689_v4 = vmul.f32 1.442695, %v1600_v23  ;;  %v1520_v37 = vpop.xlane.xlu0 %1519  ;;  %v1511_v30 = vpop.xlane.xlu1 %1510  ;;  %v3586_v9 = vadd.f32 %v3493_v50, %v1212_v58  ;;  %v1156_v38 = vld [vmem:[%s3347_s20 + $0xa0] sm:$0xff] }
 0x5b0   : > { %2686 = vpow2.f32 %v1699_v19  ;;  %v1601_v10 = vsub.f32 %v3386_v3, %v1520_v37  ;;  %v1602_v43 = vsub.f32 %v3374_v35, %v1520_v37  ;;  %v1595_v42 = vsub.f32 %v3384_v25, %v1511_v30  ;;  %v3624_v58 = vld [vmem:[%s3347_s20 + $0x80] sm:$0xff] }
 0x5b1   : > { %2688 = vpow2.f32 %v1701_v61  ;;  %v1596_v49 = vsub.f32 %v3372_v13, %v1511_v30  ;;  %v3589_v13 = vadd.f32 %v3502_v55, %v1213_v53  ;;  %v3603_v37 = vadd.f32 %v3507_v21, %v1214_v8 }
 0x5b2   : > { %2690 = vpow2.f32 %v1687_v47  ;;  %v1691_v44 = vmul.f32 1.442695, %v1601_v10  ;;  %v1693_v32 = vmul.f32 1.442695, %v1602_v43  ;;  %v1679_v3 = vmul.f32 1.442695, %v1595_v42 }
 0x5b3   : > { %2692 = vpow2.f32 %v1689_v4  ;;  %v1514_v33 = vpop.xlane.xlu0 %1513  ;;  %v1505_v14 = vpop.xlane.xlu1 %1504  ;;  %v1681_v56 = vmul.f32 1.442695, %v1596_v49  ;;  %v1208_v47 = vunpack.c.l.bf16 %v1156_v38  ;;  %v1209_v4 = vunpack.c.h.bf16 %v1156_v38 }
 0x5b4   : > { %2694 = vpow2.f32 %v1691_v44  ;;  %v1597_v35 = vsub.f32 %v3406_v6, %v1514_v33  ;;  %v1598_v2 = vsub.f32 %v3392_v48, %v1514_v33  ;;  %v1215_v6 = vunpack.c.h.bf16 %v1159_v63 }
 0x5b5   : > { %2696 = vpow2.f32 %v1693_v32  ;;  %v1591_v48 = vsub.f32 %v3403_v34, %v1505_v14  ;;  %v1592_v50 = vsub.f32 %v3390_v0, %v1505_v14  ;;  %v1545_v34 = vmax.f32 %v3586_v9, %v3589_v13  ;;  %v1157_v0 = vld [vmem:[%s3347_s20 + $0xa8] sm:$0xff] }
 0x5b6   : > { %2698 = vpow2.f32 %v1679_v3  ;;  %v1683_v23 = vmul.f32 1.442695, %v1597_v35  ;;  %v1685_v19 = vmul.f32 1.442695, %v1598_v2  ;;  %v3613_v43 = vadd.f32 %v3511_v7, %v1215_v6  ;;  %v1154_v7 = vld [vmem:[%s3347_s20 + $0x90] sm:$0xff] }
 0x5b7   : > { %v1508_v52 = vpop.xlane.xlu0 %1507  ;;  %v3591_v46 = vpop.xlane.xlu1 %1498  ;;  %2700 = vpow2.f32 %v1681_v56  ;;  %v1671_v18 = vmul.f32 1.442695, %v1591_v48  ;;  %v1673_v42 = vmul.f32 1.442695, %v1592_v50  ;;  %v3628_v53 = vadd.f32 %v3452_v59, %v1208_v47  ;;  %v1155_v50 = vld [vmem:[%s3347_s20 + $0x98] sm:$0xff] }
 0x5b8   : > { %2702 = vpow2.f32 %v1683_v23  ;;  %v1593_v44 = vsub.f32 %v3428_v62, %v1508_v52  ;;  %v1594_v32 = vsub.f32 %v3414_v45, %v1508_v52  ;;  %v3631_v62 = vadd.f32 %v3464_v24, %v1209_v4  ;;  %v4312_v4 = vld [vmem:[#allocation23_spill] sm:$0xff] }
 0x5b9   : > { %v3583_v25 = vpop.eup %2682  ;;  %2704 = vpow2.f32 %v1685_v19  ;;  %v1210_v63 = vunpack.c.l.bf16 %v1157_v0  ;;  %v1211_v3 = vunpack.c.h.bf16 %v1157_v0  ;;  %v1587_v35 = vsub.f32 %v3425_v16, %v3591_v46  ;;  %v4321_v16 = vld [vmem:[#allocation19_spill] sm:$0xff] }
 0x5ba   : > { %v3593_v31 = vpop.eup %2684  ;;  %2706 = vpow2.f32 %v1671_v18  ;;  %v1675_v45 = vmul.f32 1.442695, %v1593_v44  ;;  %v1548_v56 = vmax.f32 %v3603_v37, %v3613_v43  ;;  %v1677_v59 = vmul.f32 1.442695, %v1594_v32 }
 0x5bb   : > { %v1809_v55 = vadd.f32 %v3593_v31, %v3583_v25  ;;  %v3605_v30 = vpop.xlane.xlu0 %1501  ;;  %v1493_v49 = vpop.xlane.xlu1 %1492  ;;  %2708 = vpow2.f32 %v1673_v42  ;;  %v1588_v24 = vsub.f32 %v3411_v15, %v3591_v46  ;;  %v1204_v23 = vunpack.c.l.bf16 %v1154_v7  ;;  %v4315_v42 = vld [vmem:[#allocation14_spill] sm:$0xff] }
 0x5bc   : > { %v1589_v48 = vsub.f32 %v3450_v39, %v3605_v30  ;;  %v1205_v19 = vunpack.c.h.bf16 %v1154_v7  ;;  %v1590_v15 = vsub.f32 %v3436_v28, %v3605_v30  ;;  %v1539_v47 = vmax.f32 %v3628_v53, %v3631_v62  ;;  %v4313_v39 = vld [vmem:[#allocation16_spill] sm:$0xff] }
 0x5bd   : > { %v3600_v61 = vpop.eup %2686  ;;  %1810 = vadd.xlane.f32.xlu1 %v1809_v55  ;;  %v3651_v55 = vadd.f32 %v3473_v17, %v1210_v63  ;;  %2710 = vpow2.f32 %v1675_v45  ;;  %v1663_v0 = vmul.f32 1.442695, %v1587_v35  ;;  %v1583_v18 = vsub.f32 %v4313_v39, %v1493_v49  ;;  %v4318_v45 = vld [vmem:[#allocation11_spill] sm:$0xff] }
 0x5be   : > { %v3609_v10 = vpop.eup %2688  ;;  %2712 = vpow2.f32 %v1677_v59  ;;  %v1665_v17 = vmul.f32 1.442695, %v1588_v24  ;;  %v1584_v32 = vsub.f32 %v4315_v42, %v1493_v49  ;;  %v1207_v7 = vunpack.c.h.bf16 %v1155_v50  ;;  %v4320_v24 = vld [vmem:[#allocation18_spill] sm:$0xff] }
 0x5bf   : > { %v3616_v21 = vpop.eup %2690  ;;  %v1812_v33 = vadd.f32 %v3609_v10, %v3600_v61  ;;  %v1496_v52 = vpop.xlane.xlu0 %1495  ;;  %v1667_v63 = vmul.f32 1.442695, %v1589_v48  ;;  %v3670_v35 = vadd.f32 %v4318_v45, %v1204_v23  ;;  %v1669_v59 = vmul.f32 1.442695, %v1590_v15 }
 0x5c0   : > { %v3621_v14 = vpop.eup %2692  ;;  %v1487_v46 = vpop.xlane.xlu1 %1486  ;;  %v1586_v39 = vsub.f32 %v4320_v24, %v1496_v52  ;;  %2714 = vpow2.f32 %v1663_v0  ;;  %v1655_v42 = vmul.f32 1.442695, %v1583_v18  ;;  %v1657_v23 = vmul.f32 1.442695, %v1584_v32  ;;  %v4325_v18 = vld [vmem:[#allocation25_spill] sm:$0xff]  ;;  %v1153_v24 = vld [vmem:[%s3347_s20 + $0x88] sm:$0xff] }
 0x5c1   : > { %1813 = vadd.xlane.f32.xlu0 %v1812_v33  ;;  %1546 = vmax.xlane.f32.xlu1 %v1545_v34  ;;  %v3637_v2 = vpop.eup %2694  ;;  %v1803_v8 = vadd.f32 %v3621_v14, %v3616_v21  ;;  %v3658_v34 = vadd.f32 %v4312_v4, %v1211_v3  ;;  %v1206_v33 = vunpack.c.l.bf16 %v1155_v50  ;;  %v4317_v3 = vld [vmem:[#allocation20_spill] sm:$0xff]  ;;  %v1579_v50 = vsub.f32 %v4321_v16, %v1487_v46  ;;  %s2582_s20 = sshll.u32 %s4372_s19, 4 }
 0x5c2   : > { %v3643_v38 = vpop.eup %2696  ;;  %2716 = vpow2.f32 %v1665_v17  ;;  %v1661_v6 = vmul.f32 1.442695, %v1586_v39  ;;  %v4326_v17 = vld [vmem:[#allocation22_spill] sm:$0xff]  ;;  %s521_s29 = scalar_lea.vmem %s4237_s14, %s2582_s20  ;;  %s4370_s20 = sshll.u32 %s4372_s19, 3 }
 0x5c3   : > { %v3661_v44 = vpop.eup %2698  ;;  %v1806_v28 = vadd.f32 %v3643_v38, %v3637_v2  ;;  %v1490_v49 = vpop.xlane.xlu0 %1489  ;;  %v1542_v48 = vmax.f32 %v3651_v55, %v3658_v34  ;;  %2718 = vpow2.f32 %v1667_v63 }
 0x5c4   : > { %4314 = vst [vmem:[#allocation23_spill] sm:$0xff] %v3661_v44  ;;  %v3666_v30 = vpop.eup %2700  ;;  %v1481_v15 = vpop.xlane.xlu1 %1480  ;;  %2720 = vpow2.f32 %v1669_v59  ;;  %v1582_v32 = vsub.f32 %v4326_v17, %v1490_v49  ;;  %v4329_v59 = vld [vmem:[#allocation21_spill] sm:$0xff]  ;;  %v1203_v17 = vunpack.c.h.bf16 %v1153_v24 }
 0x5c5   : > { %1549 = vmax.xlane.f32.xlu0 %v1548_v56  ;;  %1804 = vadd.xlane.f32.xlu1 %v1803_v8  ;;  %4316 = vst [vmem:[#allocation16_spill] sm:$0xff] %v3666_v30  ;;  %v1585_v56 = vsub.f32 %v4317_v3, %v1496_v52  ;;  %v4319_v8 = vld [vmem:[#allocation12_spill] sm:$0xff]  ;;  %v3679_v3 = vpop.eup %2702  ;;  %v1797_v52 = vadd.f32 %v3666_v30, %v3661_v44  ;;  %2722 = vpow2.f32 %v1655_v42  ;;  %v4330_v42 = vunpack.c.l.bf16 %v3624_v58 }
 0x5c6   : > { %v3673_v4 = vadd.f32 %v4319_v8, %v1205_v19  ;;  %4322 = vst [vmem:[#allocation14_spill] sm:$0xff] %v3679_v3  ;;  %v4323_v19 = vld [vmem:[#allocation17_spill] sm:$0xff]  ;;  %v1581_v8 = vsub.f32 %v4325_v18, %v1490_v49  ;;  %2724 = vpow2.f32 %v1657_v23  ;;  %v1576_v39 = vsub.f32 %v4329_v59, %v1481_v15 }
 0x5c7   : > { %v1580_v45 = vsub.f32 %v4323_v19, %v1487_v46  ;;  %v1659_v16 = vmul.f32 1.442695, %v1585_v56  ;;  %v4327_v19 = vld [vmem:[#allocation15_spill] sm:$0xff]  ;;  %v1484_v30 = vpop.xlane.xlu0 %1483  ;;  %v4332_v23 = vunpack.c.h.bf16 %v3624_v58 }
 0x5c8   : > { %v1533_v46 = vmax.f32 %v3670_v35, %v3673_v4  ;;  %v3695_v44 = vadd.f32 %v4327_v19, %v1207_v7  ;;  %v1651_v7 = vmul.f32 1.442695, %v1581_v8 }
 0x5c9   : > { %1807 = vadd.xlane.f32.xlu0 %v1806_v28  ;;  %1540 = vmax.xlane.f32.xlu1 %v1539_v47  ;;  %v3684_v28 = vpop.eup %2704  ;;  %v4324_v47 = vld [vmem:[#allocation13_spill] sm:$0xff]  ;;  %v1649_v18 = vmul.f32 1.442695, %v1580_v45  ;;  %2726 = vpow2.f32 %v1659_v16  ;;  %v4333_v45 = vld [vmem:[#allocation8_spill] sm:$0xff] }
 0x5ca   : > { %v3687_v0 = vadd.f32 %v4324_v47, %v1206_v33  ;;  %v1647_v33 = vmul.f32 1.442695, %v1579_v50  ;;  %v4328_v47 = vld [vmem:[#allocation24_spill] sm:$0xff]  ;;  %v3698_v56 = vpop.eup %2706  ;;  %v1800_v49 = vadd.f32 %v3684_v28, %v3679_v3  ;;  %v4331_v50 = vld [vmem:[#allocation7_spill] sm:$0xff]  ;;  %2728 = vpow2.f32 %v1661_v6 }
 0x5cb   : > { %v1575_v63 = vsub.f32 %v4328_v47, %v1481_v15  ;;  %v3708_v19 = vadd.f32 %v4331_v50, %v4330_v42  ;;  %v3713_v47 = vadd.f32 %v4333_v45, %v4332_v23  ;;  %v1653_v15 = vmul.f32 1.442695, %v1582_v32  ;;  %v4334_v3 = vld [vmem:[#allocation27_spill] sm:$0xff]  ;;  %v4335_v50 = vld [vmem:[#allocation26_spill] sm:$0xff] }
 0x5cc   : > { %2730 = vpow2.f32 %v1647_v33  ;;  %v1536_v16 = vmax.f32 %v3687_v0, %v3695_v44  ;;  %v1641_v42 = vmul.f32 1.442695, %v1576_v39  ;;  %v1578_v58 = vsub.f32 %v4335_v50, %v1484_v30  ;;  %v2681_v6 = vld [vmem:[%s4233_s10 + $0x8] ss:$0 sps:$4 sm:$0xff]  }
 0x5cd   : > { %1543 = vmax.xlane.f32.xlu0 %v1542_v48  ;;  %1798 = vadd.xlane.f32.xlu1 %v1797_v52  ;;  %v3703_v48 = vpop.eup %2708  ;;  %v1202_v52 = vunpack.c.l.bf16 %v1153_v24  ;;  %v1639_v59 = vmul.f32 1.442695, %v1575_v63  ;;  %v1577_v24 = vsub.f32 %v4334_v3, %v1484_v30  ;;  %2732 = vpow2.f32 %v1649_v18  ;;  %v4336_v3 = vld [vmem:[#allocation9_spill] sm:$0xff]  ;;  %v4337_v18 = vld [vmem:[#allocation10_spill] sm:$0xff] }
 0x5ce   : > { %v3718_v8 = vpop.eup %2710  ;;  %v1791_v23 = vadd.f32 %v3703_v48, %v3698_v56  ;;  %2734 = vpow2.f32 %v1651_v7  ;;  %v1527_v30 = vmax.f32 %v3708_v19, %v3713_v47  ;;  %2549 = vmatmul.mubr.msk.bf16.gmra.mxu1 %vm921_vm10, %v2681_v6  ;;  %v3737_v39 = vadd.f32 %v4337_v18, %v1203_v17 }
 0x5cf   : > { %v3726_v32 = vpop.eup %2712  ;;  %2736 = vpow2.f32 %v1653_v15  ;;  %v1643_v33 = vmul.f32 1.442695, %v1577_v24 }
 0x5d0   : > { %2738 = vpow2.f32 %v1639_v59  ;;  %v3734_v63 = vpop.eup %2714  ;;  %v1794_v7 = vadd.f32 %v3726_v32, %v3718_v8 }
 0x5d1   : > { %1801 = vadd.xlane.f32.xlu0 %v1800_v49  ;;  %1534 = vmax.xlane.f32.xlu1 %v1533_v46  ;;  %v3729_v46 = vadd.f32 %v4336_v3, %v1202_v52  ;;  %2740 = vpow2.f32 %v1641_v42  ;;  %v1645_v49 = vmul.f32 1.442695, %v1578_v58  ;;  %v3741_v45 = vpop.eup %2716 }
 0x5d2   : > { %v3743_v52 = vpop.eup %2718  ;;  %2742 = vpow2.f32 %v1643_v33  ;;  %v1785_v24 = vadd.f32 %v3741_v45, %v3734_v63 }
 0x5d3   : > { %4338 = vst [vmem:[#allocation20_spill] sm:$0xff] %v3743_v52  ;;  %v3745_v15 = vpop.eup %2720  ;;  %v1530_v17 = vmax.f32 %v3729_v46, %v3737_v39  ;;  %2744 = vpow2.f32 %v1645_v49 }
 0x5d4   : > { %v3747_v59 = vpop.eup %2722 }
 0x5d5   : > { %1537 = vmax.xlane.f32.xlu0 %v1536_v16  ;;  %1792 = vadd.xlane.f32.xlu1 %v1791_v23  ;;  %4339 = vst [vmem:[#allocation11_spill] sm:$0xff] %v3747_v59  ;;  %v3753_v16 = vpop.eup %2724  ;;  %v1788_v23 = vadd.f32 %v3745_v15, %v3743_v52 }
 0x5d6   : > { %4340 = vst [vmem:[#allocation12_spill] sm:$0xff] %v3753_v16  ;;  %v3755_v42 = vpop.eup %2726  ;;  %v1779_v6 = vadd.f32 %v3753_v16, %v3747_v59 }
 0x5d7   : > { %4341 = vst [vmem:[#allocation18_spill] sm:$0xff] %v3755_v42  ;;  %v3757_v50 = vpop.eup %2728 }
 0x5d8   : > { %4342 = vst [vmem:[#allocation19_spill] sm:$0xff] %v3757_v50  ;;  %v1782_v49 = vadd.f32 %v3757_v50, %v3755_v42 }
 0x5d9   : > { %1795 = vadd.xlane.f32.xlu0 %v1794_v7  ;;  %1528 = vmax.xlane.f32.xlu1 %v1527_v30  ;;  %v3759_v58 = vpop.eup %2730 }
 0x5da   : > { %4343 = vst [vmem:[#allocation17_spill] sm:$0xff] %v3759_v58  ;;  %v3765_v3 = vpop.eup %2732 }
 0x5db   : > { %4344 = vst [vmem:[#allocation13_spill] sm:$0xff] %v3765_v3  ;;  %v3767_v33 = vpop.eup %2734  ;;  %v1773_v7 = vadd.f32 %v3765_v3, %v3759_v58 }
 0x5dc   : > { %4345 = vst [vmem:[#allocation25_spill] sm:$0xff] %v3767_v33  ;;  %v3769_v30 = vpop.eup %2736 }
 0x5dd   : > { %1531 = vmax.xlane.f32.xlu0 %v1530_v17  ;;  %1786 = vadd.xlane.f32.xlu1 %v1785_v24  ;;  %v3771_v18 = vpop.eup %2738 }
 0x5de   : > { %4346 = vst [vmem:[#allocation22_spill] sm:$0xff] %v3771_v18  ;;  %v3777_v17 = vpop.eup %2740 }
 0x5df   : > { %4347 = vst [vmem:[#allocation15_spill] sm:$0xff] %v3777_v17  ;;  %v3779_v24 = vpop.eup %2742 }
 0x5e0   : > { %4348 = vst [vmem:[#allocation24_spill] sm:$0xff] %v3779_v24  ;;  %v3785_v16 = vpop.eup %2744 }
 0x5e1   : > { %1789 = vadd.xlane.f32.xlu0 %v1788_v23  ;;  %1780 = vadd.xlane.f32.xlu1 %v1779_v6  ;;  %v1776_v23 = vadd.f32 %v3769_v30, %v3767_v33  ;;  %v1767_v6 = vadd.f32 %v3777_v17, %v3771_v18  ;;  %v1770_v52 = vadd.f32 %v3785_v16, %v3779_v24 }
 0x5e5   : > { %1783 = vadd.xlane.f32.xlu0 %v1782_v49  ;;  %1774 = vadd.xlane.f32.xlu1 %v1773_v7 }
 0x5e7   : > { %v1571_v59 = vpop.xlane.xlu1 %1570 }
 0x5e8   : > { %v1635_v42 = vsub.f32 %v3518_v26, %v1571_v59  ;;  %v1636_v50 = vsub.f32 %v3526_v54, %v1571_v59 }
 0x5e9   : > { %1777 = vadd.xlane.f32.xlu0 %v1776_v23  ;;  %1768 = vadd.xlane.f32.xlu1 %v1767_v6 }
 0x5ea   : > { %v1759_v58 = vmul.f32 1.442695, %v1635_v42  ;;  %v1761_v49 = vmul.f32 1.442695, %v1636_v50 }
 0x5eb   : > { %v1574_v7 = vpop.xlane.xlu0 %1573  ;;  %v1565_v3 = vpop.xlane.xlu1 %1564 }
 0x5ec   : > { %2746 = vpow2.f32 %v1759_v58  ;;  %v1637_v33 = vsub.f32 %v3528_v11, %v1574_v7  ;;  %v1638_v18 = vsub.f32 %v3541_v57, %v1574_v7  ;;  %v1631_v17 = vsub.f32 %v3522_v5, %v1565_v3 }
 0x5ed   : > { %2748 = vpow2.f32 %v1761_v49  ;;  %v1632_v26 = vsub.f32 %v3524_v41, %v1565_v3  ;;  %1771 = vadd.xlane.f32.xlu0 %v1770_v52 }
 0x5ee   : > { %v1763_v54 = vmul.f32 1.442695, %v1637_v33  ;;  %v1765_v59 = vmul.f32 1.442695, %v1638_v18  ;;  %v1751_v42 = vmul.f32 1.442695, %v1631_v17 }
 0x5ef   : > { %v1753_v50 = vmul.f32 1.442695, %v1632_v26  ;;  %v1568_v23 = vpop.xlane.xlu0 %1567  ;;  %v1559_v6 = vpop.xlane.xlu1 %1558 }
 0x5f0   : > { %2750 = vpow2.f32 %v1763_v54  ;;  %v1633_v24 = vsub.f32 %v3537_v40, %v1568_v23  ;;  %v1634_v58 = vsub.f32 %v3539_v36, %v1568_v23  ;;  %v1627_v11 = vsub.f32 %v3532_v60, %v1559_v6 }
 0x5f1   : > { %2752 = vpow2.f32 %v1765_v59  ;;  %v1628_v5 = vsub.f32 %v3534_v1, %v1559_v6 }
 0x5f2   : > { %2754 = vpow2.f32 %v1751_v42  ;;  %v1755_v57 = vmul.f32 1.442695, %v1633_v24  ;;  %v1757_v41 = vmul.f32 1.442695, %v1634_v58  ;;  %v1743_v52 = vmul.f32 1.442695, %v1627_v11 }
 0x5f3   : > { %2756 = vpow2.f32 %v1753_v50  ;;  %v1745_v3 = vmul.f32 1.442695, %v1628_v5  ;;  %v1562_v33 = vpop.xlane.xlu0 %1561  ;;  %v1553_v18 = vpop.xlane.xlu1 %1552 }
 0x5f4   : > { %2758 = vpow2.f32 %v1755_v57  ;;  %v1629_v17 = vsub.f32 %v3551_v51, %v1562_v33  ;;  %v1630_v40 = vsub.f32 %v3553_v29, %v1562_v33  ;;  %v1623_v36 = vsub.f32 %v3547_v20, %v1553_v18 }
 0x5f5   : > { %2760 = vpow2.f32 %v1757_v41  ;;  %v1624_v60 = vsub.f32 %v3549_v22, %v1553_v18 }
 0x5f6   : > { %2762 = vpow2.f32 %v1743_v52  ;;  %v1747_v1 = vmul.f32 1.442695, %v1629_v17  ;;  %v1749_v49 = vmul.f32 1.442695, %v1630_v40  ;;  %v1735_v24 = vmul.f32 1.442695, %v1623_v36 }
 0x5f7   : > { %2764 = vpow2.f32 %v1745_v3  ;;  %v1737_v7 = vmul.f32 1.442695, %v1624_v60  ;;  %v1556_v26 = vpop.xlane.xlu0 %1555 }
 0x5f8   : > { %2766 = vpow2.f32 %v1747_v1  ;;  %v1625_v54 = vsub.f32 %v3559_v12, %v1556_v26  ;;  %v1626_v59 = vsub.f32 %v3561_v27, %v1556_v26 }
 0x5f9   : > { %v3805_v51 = vpop.eup %2746  ;;  %2768 = vpow2.f32 %v1749_v49 }
 0x5fa   : > { %v3807_v29 = vpop.eup %2748  ;;  %2770 = vpow2.f32 %v1735_v24  ;;  %v1739_v20 = vmul.f32 1.442695, %v1625_v54  ;;  %v1741_v22 = vmul.f32 1.442695, %v1626_v59 }
 0x5fb   : > { %2772 = vpow2.f32 %v1737_v7  ;;  %v1857_v42 = vadd.f32 %v3807_v29, %v3805_v51 }
 0x5fc   : > { %2774 = vpow2.f32 %v1739_v20 }
 0x5fd   : > { %v3811_v50 = vpop.eup %2750  ;;  %2776 = vpow2.f32 %v1741_v22  ;;  %1858 = vadd.xlane.f32.xlu1 %v1857_v42 }
 0x5fe   : > { %v3813_v12 = vpop.eup %2752 }
 0x5ff   : > { %v3815_v27 = vpop.eup %2754  ;;  %v1860_v23 = vadd.f32 %v3813_v12, %v3811_v50 }
 0x600   : > { %v3819_v6 = vpop.eup %2756 }
 0x601   : > { %v3821_v58 = vpop.eup %2758  ;;  %1861 = vadd.xlane.f32.xlu0 %v1860_v23  ;;  %v1851_v11 = vadd.f32 %v3819_v6, %v3815_v27 }
 0x602   : > { %v3825_v5 = vpop.eup %2760 }
 0x603   : > { %v3827_v57 = vpop.eup %2762  ;;  %1852 = vadd.xlane.f32.xlu1 %v1851_v11  ;;  %v1854_v41 = vadd.f32 %v3825_v5, %v3821_v58 }
 0x604   : > { %v3831_v52 = vpop.eup %2764 }
 0x605   : > { %v3833_v3 = vpop.eup %2766  ;;  %1855 = vadd.xlane.f32.xlu0 %v1854_v41  ;;  %v1845_v33 = vadd.f32 %v3831_v52, %v3827_v57 }
 0x606   : > { %v3837_v18 = vpop.eup %2768 }
 0x607   : > { %v3839_v17 = vpop.eup %2770  ;;  %1846 = vadd.xlane.f32.xlu1 %v1845_v33  ;;  %v1848_v40 = vadd.f32 %v3837_v18, %v3833_v3 }
 0x608   : > { %v3843_v36 = vpop.eup %2772 }
 0x609   : > { %v3845_v60 = vpop.eup %2774  ;;  %1849 = vadd.xlane.f32.xlu0 %v1848_v40  ;;  %v1839_v1 = vadd.f32 %v3843_v36, %v3839_v17 }
 0x60a   : > { %v3849_v49 = vpop.eup %2776 }
 0x60b   : > { %1840 = vadd.xlane.f32.xlu1 %v1839_v1  ;;  %v1842_v24 = vadd.f32 %v3849_v49, %v3845_v60 }
 0x60d   : > { %1843 = vadd.xlane.f32.xlu0 %v1842_v24 }
 0x646   : > { %v1811_v7 = vpop.xlane.xlu1 %1810 }
 0x647   : > { %2778 = vrcp.f32 %v1811_v7 }
 0x64a   : > { %v1814_v26 = vpop.xlane.xlu0 %1813  ;;  %v1547_v54 = vpop.xlane.xlu1 %1546 }
 0x64b   : > { %2780 = vrcp.f32 %v1814_v26  ;;  %v1619_v59 = vsub.f32 %v3586_v9, %v1547_v54  ;;  %v1620_v20 = vsub.f32 %v3589_v13, %v1547_v54 }
 0x64d   : > { %v1727_v22 = vmul.f32 1.442695, %v1619_v59  ;;  %v1729_v42 = vmul.f32 1.442695, %v1620_v20 }
 0x64e   : > { %v1550_v23 = vpop.xlane.xlu0 %1549  ;;  %v1805_v11 = vpop.xlane.xlu1 %1804 }
 0x64f   : > { %2782 = vpow2.f32 %v1727_v22  ;;  %v1621_v41 = vsub.f32 %v3603_v37, %v1550_v23  ;;  %v1622_v33 = vsub.f32 %v3613_v43, %v1550_v23 }
 0x650   : > { %2784 = vpow2.f32 %v1729_v42 }
 0x651   : > { %v1731_v40 = vmul.f32 1.442695, %v1621_v41  ;;  %v1733_v1 = vmul.f32 1.442695, %v1622_v33  ;;  %2786 = vrcp.f32 %v1805_v11 }
 0x652   : > { %v1808_v24 = vpop.xlane.xlu0 %1807  ;;  %v1541_v7 = vpop.xlane.xlu1 %1540 }
 0x653   : > { %2788 = vpow2.f32 %v1731_v40  ;;  %v1615_v9 = vsub.f32 %v3628_v53, %v1541_v7  ;;  %v1616_v13 = vsub.f32 %v3631_v62, %v1541_v7 }
 0x654   : > { %2790 = vpow2.f32 %v1733_v1  ;;  %v2779_v59 = vpop.eup %2778 }
 0x655   : > { %2792 = vrcp.f32 %v1808_v24  ;;  %v1719_v26 = vmul.f32 1.442695, %v1615_v9  ;;  %v1721_v54 = vmul.f32 1.442695, %v1616_v13  ;;  %v1907_v53 = vmul.f32 %v2779_v59, %v3593_v31 }
 0x656   : > { %v1544_v20 = vpop.xlane.xlu0 %1543  ;;  %v1799_v37 = vpop.xlane.xlu1 %1798  ;;  %v1906_v40 = vmul.f32 %v2779_v59, %v3583_v25 }
 0x657   : > { %2794 = vpow2.f32 %v1719_v26  ;;  %v1617_v43 = vsub.f32 %v3651_v55, %v1544_v20  ;;  %v1618_v22 = vsub.f32 %v3658_v34, %v1544_v20 }
 0x658   : > { %v2781_v42 = vpop.eup %2780  ;;  %2796 = vpow2.f32 %v1721_v54 }
 0x659   : > { %v1723_v23 = vmul.f32 1.442695, %v1617_v43  ;;  %v1725_v11 = vmul.f32 1.442695, %v1618_v22  ;;  %v1910_v62 = vmul.f32 %v2781_v42, %v3609_v10  ;;  %2798 = vrcp.f32 %v1799_v37 }
 0x65a   : > { %v1802_v41 = vpop.xlane.xlu0 %1801  ;;  %v1535_v33 = vpop.xlane.xlu1 %1534  ;;  %v1909_v1 = vmul.f32 %v2781_v42, %v3600_v61 }
 0x65b   : > { %2800 = vpow2.f32 %v1723_v23  ;;  %v1611_v55 = vsub.f32 %v3670_v35, %v1535_v33  ;;  %v1612_v34 = vsub.f32 %v3673_v4, %v1535_v33  ;;  %v1974_v24 = vpack.c.bf16 %v1910_v62, %v1907_v53 }
 0x65c   : > { %v3867_v7 = vpop.eup %2782  ;;  %2802 = vpow2.f32 %v1725_v11  ;;  %v1973_v9 = vpack.c.bf16 %v1909_v1, %v1906_v40 }
 0x65d   : > { %v3869_v31 = vpop.eup %2784  ;;  %2804 = vrcp.f32 %v1802_v41  ;;  %v1711_v10 = vmul.f32 1.442695, %v1611_v55  ;;  %v1713_v13 = vmul.f32 1.442695, %v1612_v34  ;;  %1991 = vmatprep.subr.bf16.mxu1 %v1974_v24 }
 0x65e   : > { %v1538_v26 = vpop.xlane.xlu0 %1537  ;;  %1992 = vmatpush1.bf16.xpose.msra.mxu1 %v1973_v9  ;;  %v1793_v25 = vpop.xlane.xlu1 %1792  ;;  %v1833_v61 = vadd.f32 %v3869_v31, %v3867_v7 }
 0x65f   : > { %v2787_v35 = vpop.eup %2786  ;;  %2806 = vpow2.f32 %v1711_v10  ;;  %v1613_v4 = vsub.f32 %v3687_v0, %v1538_v26  ;;  %v1614_v54 = vsub.f32 %v3695_v44, %v1538_v26 }
 0x660   : > { %v3875_v59 = vpop.eup %2788  ;;  %2808 = vpow2.f32 %v1713_v13  ;;  %1834 = vadd.xlane.f32.xlu1 %v1833_v61  ;;  %v1901_v53 = vmul.f32 %v2787_v35, %v3621_v14  ;;  %v1900_v33 = vmul.f32 %v2787_v35, %v3616_v21 }
 0x661   : > { %v3877_v20 = vpop.eup %2790  ;;  %v1715_v37 = vmul.f32 1.442695, %v1613_v4  ;;  %v1717_v43 = vmul.f32 1.442695, %v1614_v54  ;;  %2810 = vrcp.f32 %v1793_v25  ;;  %v4349_v54 = vld [vmem:[#allocation16_spill] sm:$0xff] }
 0x662   : > { %v2793_v22 = vpop.eup %2792  ;;  %v1796_v42 = vpop.xlane.xlu0 %1795  ;;  %v1836_v11 = vadd.f32 %v3877_v20, %v3875_v59 }
 0x663   : > { %v1529_v23 = vpop.xlane.xlu1 %1528  ;;  %2812 = vpow2.f32 %v1715_v37  ;;  %v1904_v62 = vmul.f32 %v2793_v22, %v3643_v38  ;;  %v1903_v40 = vmul.f32 %v2793_v22, %v3637_v2 }
 0x664   : > { %v1607_v44 = vsub.f32 %v3708_v19, %v1529_v23  ;;  %v1608_v0 = vsub.f32 %v3713_v47, %v1529_v23  ;;  %v3885_v41 = vpop.eup %2794  ;;  %2814 = vpow2.f32 %v1717_v43  ;;  %1837 = vadd.xlane.f32.xlu0 %v1836_v11  ;;  %v4350_v43 = vld [vmem:[#allocation23_spill] sm:$0xff] }
 0x665   : > { %v3889_v1 = vpop.eup %2796  ;;  %2816 = vrcp.f32 %v1796_v42  ;;  %v1972_v34 = vpack.c.bf16 %v1904_v62, %v1901_v53  ;;  %v1971_v19 = vpack.c.bf16 %v1903_v40, %v1900_v33  ;;  %v4351_v42 = vld [vmem:[#allocation14_spill] sm:$0xff] }
 0x666   : > { %v1703_v55 = vmul.f32 1.442695, %v1607_v44  ;;  %v1705_v14 = vmul.f32 1.442695, %v1608_v0  ;;  %v1532_v24 = vpop.xlane.xlu0 %1531  ;;  %v1827_v38 = vadd.f32 %v3889_v1, %v3885_v41  ;;  %v2799_v47 = vpop.eup %2798 }
 0x667   : > { %v1787_v9 = vpop.xlane.xlu1 %1786  ;;  %1993 = vmatprep.subr.bf16.mxu1 %v1972_v34  ;;  %v1609_v10 = vsub.f32 %v3729_v46, %v1532_v24  ;;  %v1610_v21 = vsub.f32 %v3737_v39, %v1532_v24  ;;  %v1895_v37 = vmul.f32 %v2799_v47, %v4349_v54  ;;  %v1894_v22 = vmul.f32 %v2799_v47, %v4350_v43 }
 0x668   : > { %2818 = vpow2.f32 %v1703_v55  ;;  %v3895_v2 = vpop.eup %2800  ;;  %1994 = vmatpush1.bf16.xpose.msra.mxu1 %v1971_v19  ;;  %1828 = vadd.xlane.f32.xlu1 %v1827_v38 }
 0x669   : > { %2820 = vpow2.f32 %v1705_v14  ;;  %v3897_v13 = vpop.eup %2802  ;;  %v1707_v26 = vmul.f32 1.442695, %v1609_v10  ;;  %v1709_v25 = vmul.f32 1.442695, %v1610_v21 }
 0x66a   : > { %v2805_v61 = vpop.eup %2804  ;;  %2822 = vrcp.f32 %v1787_v9  ;;  %v1790_v35 = vpop.xlane.xlu0 %1789  ;;  %v1830_v4 = vadd.f32 %v3897_v13, %v3895_v2 }
 0x66b   : > { %2824 = vpow2.f32 %v1707_v26  ;;  %v1781_v46 = vpop.xlane.xlu1 %1780  ;;  %v1898_v39 = vmul.f32 %v2805_v61, %v3684_v28  ;;  %v1897_v23 = vmul.f32 %v2805_v61, %v4351_v42  ;;  %v4352_v42 = vld [vmem:[#allocation20_spill] sm:$0xff] }
 0x66c   : > { %v3905_v11 = vpop.eup %2806  ;;  %2826 = vpow2.f32 %v1709_v25  ;;  %1831 = vadd.xlane.f32.xlu0 %v1830_v4 }
 0x66d   : > { %v3907_v53 = vpop.eup %2808  ;;  %2828 = vrcp.f32 %v1790_v35  ;;  %v1970_v44 = vpack.c.bf16 %v1898_v39, %v1895_v37  ;;  %v1969_v0 = vpack.c.bf16 %v1897_v23, %v1894_v22 }
 0x66e   : > { %2830 = vrcp.f32 %v1781_v46  ;;  %v1784_v62 = vpop.xlane.xlu0 %1783  ;;  %v1821_v33 = vadd.f32 %v3907_v53, %v3905_v11  ;;  %v2811_v40 = vpop.eup %2810 }
 0x66f   : > { %1995 = vmatprep.subr.bf16.mxu1 %v1970_v44  ;;  %2832 = vrcp.f32 %v1784_v62  ;;  %v1775_v34 = vpop.xlane.xlu1 %1774  ;;  %v1889_v9 = vmul.f32 %v2811_v40, %v3703_v48  ;;  %v1888_v47 = vmul.f32 %v2811_v40, %v3698_v56 }
 0x670   : > { %v3911_v28 = vpop.eup %2812  ;;  %1996 = vmatpush1.bf16.xpose.msra.mxu1 %v1969_v0  ;;  %1822 = vadd.xlane.f32.xlu1 %v1821_v33  ;;  %v4353_v33 = vld [vmem:[#allocation12_spill] sm:$0xff] }
 0x671   : > { %v3913_v55 = vpop.eup %2814 }
 0x672   : > { %v2817_v14 = vpop.eup %2816  ;;  %v1778_v24 = vpop.xlane.xlu0 %1777  ;;  %v1824_v19 = vadd.f32 %v3913_v55, %v3911_v28 }
 0x673   : > { %2834 = vrcp.f32 %v1778_v24  ;;  %v1892_v38 = vmul.f32 %v2817_v14, %v3726_v32  ;;  %v1891_v10 = vmul.f32 %v2817_v14, %v3718_v8  ;;  %v1769_v8 = vpop.xlane.xlu1 %1768  ;;  %v4354_v14 = vld [vmem:[#allocation19_spill] sm:$0xff] }
 0x674   : > { %1825 = vadd.xlane.f32.xlu0 %v1824_v19  ;;  %2836 = vrcp.f32 %v1775_v34 }
 0x675   : > { %v3921_v21 = vpop.eup %2818  ;;  %v1968_v25 = vpack.c.bf16 %v1892_v38, %v1889_v9  ;;  %v1967_v61 = vpack.c.bf16 %v1891_v10, %v1888_v47  ;;  %v4356_v38 = vld [vmem:[#allocation11_spill] sm:$0xff]  ;;  %v4357_v10 = vld [vmem:[#allocation13_spill] sm:$0xff] }
 0x676   : > { %v3923_v26 = vpop.eup %2820  ;;  %v1772_v48 = vpop.xlane.xlu0 %1771 }
 0x677   : > { %v1815_v35 = vadd.f32 %v3923_v26, %v3921_v21  ;;  %v2823_v4 = vpop.eup %2822  ;;  %1997 = vmatprep.subr.bf16.mxu1 %v1968_v25  ;;  %2838 = vrcp.f32 %v1772_v48 }
 0x678   : > { %v3927_v54 = vpop.eup %2824  ;;  %1998 = vmatpush1.bf16.xpose.msra.mxu1 %v1967_v61  ;;  %v1883_v39 = vmul.f32 %v2823_v4, %v3741_v45  ;;  %v1882_v22 = vmul.f32 %v2823_v4, %v3734_v63  ;;  %2840 = vrcp.f32 %v1769_v8 }
 0x679   : > { %1816 = vadd.xlane.f32.xlu1 %v1815_v35  ;;  %v3929_v56 = vpop.eup %2826 }
 0x67a   : > { %v2829_v32 = vpop.eup %2828  ;;  %v1818_v37 = vadd.f32 %v3929_v56, %v3927_v54 }
 0x67b   : > { %v2831_v46 = vpop.eup %2830  ;;  %v1886_v43 = vmul.f32 %v2829_v32, %v3745_v15  ;;  %v1885_v23 = vmul.f32 %v2829_v32, %v4352_v42  ;;  %v4355_v15 = vld [vmem:[#allocation18_spill] sm:$0xff] }
 0x67c   : > { %v2833_v44 = vpop.eup %2832  ;;  %1819 = vadd.xlane.f32.xlu0 %v1818_v37  ;;  %v1877_v40 = vmul.f32 %v2831_v46, %v4353_v33  ;;  %v1876_v47 = vmul.f32 %v2831_v46, %v4356_v38  ;;  %v4358_v37 = vld [vmem:[#allocation25_spill] sm:$0xff]  ;;  %v4360_v46 = vld [vmem:[#allocation15_spill] sm:$0xff] }
 0x67d   : > { %v1966_v0 = vpack.c.bf16 %v1886_v43, %v1883_v39  ;;  %v1965_v62 = vpack.c.bf16 %v1885_v23, %v1882_v22  ;;  %v1880_v34 = vmul.f32 %v2833_v44, %v4354_v14  ;;  %v1879_v9 = vmul.f32 %v2833_v44, %v4355_v15  ;;  %v4361_v14 = vld [vmem:[#allocation24_spill] sm:$0xff] }
 0x67f   : > { %1999 = vmatprep.subr.bf16.mxu1 %v1966_v0  ;;  %v1964_v24 = vpack.c.bf16 %v1880_v34, %v1877_v40  ;;  %v1963_v61 = vpack.c.bf16 %v1879_v9, %v1876_v47 }
 0x680   : > { %v2835_v19 = vpop.eup %2834  ;;  %2000 = vmatpush1.bf16.xpose.msra.mxu1 %v1965_v62 }
 0x681   : > { %2001 = vmatprep.subr.bf16.mxu1 %v1964_v24  ;;  %v2837_v45 = vpop.eup %2836  ;;  %v1874_v63 = vmul.f32 %v2835_v19, %v3769_v30  ;;  %v1873_v39 = vmul.f32 %v2835_v19, %v4358_v37  ;;  %v4359_v30 = vld [vmem:[#allocation17_spill] sm:$0xff]  ;;  %v4362_v24 = vld [vmem:[#allocation22_spill] sm:$0xff] }
 0x682   : > { %v1871_v25 = vmul.f32 %v2837_v45, %v4357_v10  ;;  %v1870_v42 = vmul.f32 %v2837_v45, %v4359_v30 }
 0x684   : > { %v2839_v4 = vpop.eup %2838  ;;  %v1962_v48 = vpack.c.bf16 %v1874_v63, %v1871_v25  ;;  %v1961_v0 = vpack.c.bf16 %v1873_v39, %v1870_v42 }
 0x685   : > { %v2841_v8 = vpop.eup %2840  ;;  %v1868_v43 = vmul.f32 %v2839_v4, %v3785_v16  ;;  %v1867_v34 = vmul.f32 %v2839_v4, %v4361_v14 }
 0x686   : > { %v1859_v35 = vpop.xlane.xlu1 %1858  ;;  %v1865_v23 = vmul.f32 %v2841_v8, %v4360_v46  ;;  %v1864_v19 = vmul.f32 %v2841_v8, %v4362_v24 }
 0x687   : > { %2842 = vrcp.f32 %v1859_v35 }
 0x688   : > { %2002 = vmatpush1.bf16.xpose.msra.mxu1 %v1963_v61  ;;  %v1960_v62 = vpack.c.bf16 %v1868_v43, %v1865_v23  ;;  %v1959_v15 = vpack.c.bf16 %v1867_v34, %v1864_v19 }
 0x689   : > { %2003 = vmatprep.subr.bf16.mxu1 %v1962_v48 }
 0x68a   : > { %v1862_v32 = vpop.xlane.xlu0 %1861 }
 0x68b   : > { %2844 = vrcp.f32 %v1862_v32 }
 0x68c   : > { %v1853_v22 = vpop.xlane.xlu1 %1852 }
 0x68d   : > { %2846 = vrcp.f32 %v1853_v22 }
 0x68e   : > { %v1856_v44 = vpop.xlane.xlu0 %1855  ;;  %v3949_v45 = vpop.f32.mrf.mxu1 }
 0x68f   : > { %2848 = vrcp.f32 %v1856_v44 }
 0x690   : > { %2004 = vmatpush1.bf16.xpose.msra.mxu1 %v1961_v0  ;;  %v1847_v33 = vpop.xlane.xlu1 %1846  ;;  %v1047_v38 = vpop.f32.mrf.mxu1 }
 0x691   : > { %2005 = vmatprep.subr.bf16.mxu1 %v1960_v62  ;;  %v1055_v61 = vpack.c.bf16 %v1047_v38, %v1047_v38 }
 0x692   : > { %v1850_v40 = vpop.xlane.xlu0 %1849  ;;  %v1049_v8 = vpop.f32.mrf.mxu1 }
 0x693   : > { %2850 = vrcp.f32 %v1850_v40  ;;  %2023 = vmatprep.mubr.bf16.mxu1 %v1055_v61 }
 0x694   : > { %2852 = vrcp.f32 %v1847_v33  ;;  %v2843_v16 = vpop.eup %2842  ;;  %v1841_v4 = vpop.xlane.xlu1 %1840 }
 0x695   : > { %v1955_v47 = vmul.f32 %v2843_v16, %v3807_v29  ;;  %v1954_v48 = vmul.f32 %v2843_v16, %v3805_v51  ;;  %v1050_v43 = vpop.f32.mrf.mxu1 }
 0x696   : > { %v1844_v63 = vpop.xlane.xlu0 %1843 }
 0x697   : > { %2854 = vrcp.f32 %v1844_v63 }
 0x698   : > { %v2845_v9 = vpop.eup %2844  ;;  %2006 = vmatpush1.bf16.xpose.msra.mxu1 %v1959_v15  ;;  %2856 = vrcp.f32 %v1841_v4 }
 0x699   : > { %v1958_v10 = vmul.f32 %v2845_v9, %v3813_v12  ;;  %v1957_v25 = vmul.f32 %v2845_v9, %v3811_v50 }
 0x69a   : > { %v2847_v35 = vpop.eup %2846 }
 0x69b   : > { %v1990_v32 = vpack.c.bf16 %v1958_v10, %v1955_v47  ;;  %v1989_v39 = vpack.c.bf16 %v1957_v25, %v1954_v48  ;;  %v1949_v29 = vmul.f32 %v2847_v35, %v3819_v6  ;;  %v1948_v46 = vmul.f32 %v2847_v35, %v3815_v27 }
 0x69c   : > { %v2849_v37 = vpop.eup %2848 }
 0x69d   : > { %2007 = vmatprep.subr.bf16.mxu1 %v1990_v32  ;;  %v1952_v12 = vmul.f32 %v2849_v37, %v3825_v5  ;;  %v1951_v51 = vmul.f32 %v2849_v37, %v3821_v58 }
 0x69f   : > { %v1988_v22 = vpack.c.bf16 %v1952_v12, %v1949_v29  ;;  %v1987_v44 = vpack.c.bf16 %v1951_v51, %v1948_v46 }
 0x6a0   : > { %v2851_v50 = vpop.eup %2850  ;;  %2008 = vmatpush2.bf16.xpose.msra.mxu1 %v1989_v39 }
 0x6a1   : > { %2009 = vmatprep.subr.bf16.mxu1 %v1988_v22  ;;  %v2853_v30 = vpop.eup %2852  ;;  %v1946_v42 = vmul.f32 %v2851_v50, %v3837_v18  ;;  %v1945_v5 = vmul.f32 %v2851_v50, %v3833_v3 }
 0x6a2   : > { %v1943_v23 = vmul.f32 %v2853_v30, %v3831_v52  ;;  %v1942_v40 = vmul.f32 %v2853_v30, %v3827_v57 }
 0x6a4   : > { %v1986_v0 = vpack.c.bf16 %v1946_v42, %v1943_v23  ;;  %v2855_v62 = vpop.eup %2854  ;;  %v1985_v14 = vpack.c.bf16 %v1945_v5, %v1942_v40  ;;  %v2032_v23 = vld [vmem:[%s4234_s11] sm:$0xf] }
 0x6a5   : > { %v2857_v6 = vpop.eup %2856  ;;  %v1940_v33 = vmul.f32 %v2855_v62, %v3849_v49  ;;  %v1939_v27 = vmul.f32 %v2855_v62, %v3845_v60 }
 0x6a6   : > { %v1937_v58 = vmul.f32 %v2857_v6, %v3843_v36  ;;  %v1936_v52 = vmul.f32 %v2857_v6, %v3839_v17  ;;  %v4365_v6 = vld [vmem:[#allocation6_spill] sm:$0xff] }
 0x6a8   : > { %2010 = vmatpush2.bf16.xpose.msra.mxu1 %v1987_v44  ;;  %v1984_v18 = vpack.c.bf16 %v1940_v33, %v1937_v58  ;;  %v1983_v34 = vpack.c.bf16 %v1939_v27, %v1936_v52  ;;  %v4364_v44 = vld [vmem:[#allocation5_spill] sm:$0xff]  ;;  %v2342_v58 = vld [vmem:[%s4236_s13] sm:$0xff]  ;;  %v2340_v27 = vld [vmem:[%s4226_s3 + $0xf0] sm:$0xff] }
 0x6a9   : > { %2011 = vmatprep.subr.bf16.mxu1 %v1986_v0  ;;  %v2324_v52 = vld [vmem:[%s4226_s3 + $0x70] sm:$0xff] }
 0x6b0   : > { %2012 = vmatpush2.bf16.xpose.msra.mxu1 %v1985_v14  ;;  %v2341_v14 = vld [vmem:[%s4226_s3 + $0xf8] sm:$0xff] }
 0x6b1   : > { %2013 = vmatprep.subr.bf16.mxu1 %v1984_v18  ;;  %v2325_v18 = vld [vmem:[%s4226_s3 + $0x78] sm:$0xff] }
 0x6b8   : > { %2014 = vmatpush2.bf16.xpose.msra.mxu1 %v1983_v34  ;;  %v2339_v34 = vld [vmem:[%s4226_s3 + $0xe8] sm:$0xff] }
 0x6e9   : > { %v1835_v24 = vpop.xlane.xlu1 %1834 }
 0x6ea   : > { %2858 = vrcp.f32 %v1835_v24  ;;  %v2323_v24 = vld [vmem:[%s4226_s3 + $0x68] sm:$0xff] }
 0x6ed   : > { %v1838_v19 = vpop.xlane.xlu0 %1837 }
 0x6ee   : > { %2860 = vrcp.f32 %v1838_v19  ;;  %v2338_v19 = vld [vmem:[%s4226_s3 + $0xe0] sm:$0xff] }
 0x6f1   : > { %v1829_v3 = vpop.xlane.xlu1 %1828 }
 0x6f2   : > { %2862 = vrcp.f32 %v1829_v3  ;;  %v2322_v3 = vld [vmem:[%s4226_s3 + $0x60] sm:$0xff] }
 0x6f5   : > { %v1832_v49 = vpop.xlane.xlu0 %1831 }
 0x6f6   : > { %2864 = vrcp.f32 %v1832_v49  ;;  %v2337_v49 = vld [vmem:[%s4226_s3 + $0xd8] sm:$0xff] }
 0x6f7   : > { %v2859_v57 = vpop.eup %2858 }
 0x6f8   : > { %v1931_v15 = vmul.f32 %v2859_v57, %v3869_v31  ;;  %v1930_v17 = vmul.f32 %v2859_v57, %v3867_v7  ;;  %v2321_v57 = vld [vmem:[%s4226_s3 + $0x58] sm:$0xff] }
 0x6f9   : > { %v1823_v36 = vpop.xlane.xlu1 %1822 }
 0x6fa   : > { %2866 = vrcp.f32 %v1823_v36  ;;  %v2336_v36 = vld [vmem:[%s4226_s3 + $0xd0] sm:$0xff] }
 0x6fb   : > { %v2861_v16 = vpop.eup %2860 }
 0x6fc   : > { %v1934_v60 = vmul.f32 %v2861_v16, %v3877_v20  ;;  %v1933_v9 = vmul.f32 %v2861_v16, %v3875_v59  ;;  %v2320_v16 = vld [vmem:[%s4226_s3 + $0x50] sm:$0xff] }
 0x6fd   : > { %v1826_v63 = vpop.xlane.xlu0 %1825 }
 0x6fe   : > { %2868 = vrcp.f32 %v1826_v63  ;;  %v1982_v38 = vpack.c.bf16 %v1934_v60, %v1931_v15  ;;  %v1981_v47 = vpack.c.bf16 %v1933_v9, %v1930_v17  ;;  %v2335_v15 = vld [vmem:[%s4226_s3 + $0xc8] sm:$0xff]  ;;  %v2334_v17 = vld [vmem:[%s4226_s3 + $0xc0] sm:$0xff]  ;;  %v2333_v63 = vld [vmem:[%s4226_s3 + $0xb8] sm:$0xff] }
 0x6ff   : > { %v2863_v10 = vpop.eup %2862  ;;  %v2319_v60 = vld [vmem:[%s4226_s3 + $0x48] sm:$0xff]  ;;  %v2318_v9 = vld [vmem:[%s4226_s3 + $0x40] sm:$0xff] }
 0x700   : > { %2015 = vmatprep.subr.bf16.mxu1 %v1982_v38  ;;  %v1925_v35 = vmul.f32 %v2863_v10, %v3889_v1  ;;  %v1924_v20 = vmul.f32 %v2863_v10, %v3885_v41  ;;  %v2317_v38 = vld [vmem:[%s4226_s3 + $0x38] sm:$0xff]  ;;  %v2316_v10 = vld [vmem:[%s4226_s3 + $0x30] sm:$0xff] }
 0x701   : > { %2016 = vmatpush2.bf16.xpose.msra.mxu1 %v1981_v47  ;;  %v2332_v47 = vld [vmem:[%s4226_s3 + $0xb0] sm:$0xff] }
 0x702   : > { %v1817_v25 = vpop.xlane.xlu1 %1816 }
 0x703   : > { %v2865_v61 = vpop.eup %2864  ;;  %2870 = vrcp.f32 %v1817_v25  ;;  %v2331_v25 = vld [vmem:[%s4226_s3 + $0xa8] sm:$0xff] }
 0x704   : > { %v1928_v31 = vmul.f32 %v2865_v61, %v3897_v13  ;;  %v1927_v7 = vmul.f32 %v2865_v61, %v3895_v2  ;;  %v2315_v61 = vld [vmem:[%s4226_s3 + $0x28] sm:$0xff] }
 0x705   : > { %v1820_v4 = vpop.xlane.xlu0 %1819 }
 0x706   : > { %2872 = vrcp.f32 %v1820_v4  ;;  %v1980_v59 = vpack.c.bf16 %v1928_v31, %v1925_v35  ;;  %v1979_v48 = vpack.c.bf16 %v1927_v7, %v1924_v20  ;;  %v2330_v35 = vld [vmem:[%s4226_s3 + $0xa0] sm:$0xff]  ;;  %v2329_v20 = vld [vmem:[%s4226_s3 + $0x98] sm:$0xff]  ;;  %v2328_v4 = vld [vmem:[%s4226_s3 + $0x90] sm:$0xff] }
 0x707   : > { %v2867_v8 = vpop.eup %2866  ;;  %v2314_v31 = vld [vmem:[%s4226_s3 + $0x20] sm:$0xff]  ;;  %v2313_v7 = vld [vmem:[%s4226_s3 + $0x18] sm:$0xff] }
 0x708   : > { %2017 = vmatprep.subr.bf16.mxu1 %v1980_v59  ;;  %v1919_v37 = vmul.f32 %v2867_v8, %v3907_v53  ;;  %v1918_v1 = vmul.f32 %v2867_v8, %v3905_v11  ;;  %v1054_v11 = vpack.c.bf16 %v3949_v45, %v3949_v45  ;;  %v2312_v59 = vld [vmem:[%s4226_s3 + $0x10] sm:$0xff] }
 0x709   : > { %2018 = vmatpush2.bf16.xpose.msra.mxu1 %v1979_v48 }
 0x70b   : > { %v2869_v32 = vpop.eup %2868 }
 0x70c   : > { %v1922_v39 = vmul.f32 %v2869_v32, %v3913_v55  ;;  %v1921_v13 = vmul.f32 %v2869_v32, %v3911_v28  ;;  %v4363_v28 = vmov 0   ;;  %v2575_v32 = vld [vmem:[%s4225_s2 + $0x10] ss:$8 sm:$0x3] }
 0x70e   : > { %v1978_v43 = vpack.c.bf16 %v1922_v39, %v1919_v37  ;;  %v1977_v41 = vpack.c.bf16 %v1921_v13, %v1918_v1  ;;  %v2573_v1 = vld [vmem:[%s4225_s2 + $0x6] ss:$8 sm:$0x3]  ;;  %v4367_v13 = vld [vmem:[#allocation4_spill] sm:$0xff] }
 0x710   : > { %2019 = vmatprep.subr.bf16.mxu1 %v1978_v43  ;;  %v2871_v2 = vpop.eup %2870  ;;  %v2241_v43 = vrot.slane %v2575_v32, %v4367_v13 }
 0x711   : > { %2020 = vmatpush2.bf16.xpose.msra.mxu1 %v1977_v41  ;;  %v1913_v12 = vmul.f32 %v2871_v2, %v3923_v26  ;;  %v1912_v50 = vmul.f32 %v2871_v2, %v3921_v21  ;;  %v4368_v41 = vld [vmem:[#allocation3_spill] sm:$0xff] }
 0x712   : > { %v2245_v2 = vrot.slane %v2575_v32, %v4368_v41  ;;  %v2569_v32 = vld [vmem:[%s4225_s2 + $0x1] ss:$8 sm:$0x3] }
 0x713   : > { %v2873_v29 = vpop.eup %2872 }
 0x714   : > { %v1916_v22 = vmul.f32 %v2873_v29, %v3929_v56  ;;  %v1915_v53 = vmul.f32 %v2873_v29, %v3927_v54  ;;  %v2574_v29 = vld [vmem:[%s4225_s2 + $0x7] ss:$8 sm:$0x3] }
 0x716   : > { %v1976_v30 = vpack.c.bf16 %v1916_v22, %v1913_v12  ;;  %v1975_v55 = vpack.c.bf16 %v1915_v53, %v1912_v50  ;;  %v2201_v12 = vrot.slane %v2573_v1, %v4367_v13  ;;  %v2205_v53 = vrot.slane %v2573_v1, %v4368_v41 }
 0x718   : > { %2021 = vmatprep.subr.bf16.mxu1 %v1976_v30  ;;  %v2311_v30 = vld [vmem:[%s4226_s3 + $0x8] sm:$0xff] }
 0x719   : > { %2022 = vmatpush2.bf16.xpose.msra.mxu1 %v1975_v55 }
 0x720   : > { %2024 = vmatmul.mubr.bf16.vlgmr.msra.gmra.mxu1 %v1054_v11 }
 0x721   : > { %2301 = vmatprep.mubr.bf16.mxu1 %v4363_v28  ;;  %v2221_v28 = vrot.slane %v2574_v29, %v4367_v13 }
 0x7e0   : > { %v2025_v51 = vpop.f32.mrf.mxu1 }
 0x7e1   : > { %v2033_v42 = vpack.c.bf16 %v2025_v51, %v2025_v51  ;;  %v2572_v51 = vld [vmem:[%s4225_s2 + $0x5] ss:$8 sm:$0x3] }
 0x7e2   : > { %v2027_v26 = vpop.f32.mrf.mxu1 }
 0x7e3   : > { %v2034_v46 = vpack.c.bf16 %v2027_v26, %v2027_v26  ;;  %v2039_v21 = vsel %vm728_vm3, %v2033_v42, 0 }
 0x7e4   : > { %v2029_v56 = vpop.f32.mrf.mxu1 }
 0x7e5   : > { %2567 = vmatprep.subr.msk.bf16.mxu0 %vm728_vm3, %v2034_v46  ;;  %v2225_v56 = vrot.slane %v2574_v29, %v4368_v41  ;;  %v2121_v29 = vrot.slane %v2569_v32, %v4367_v13 }
 0x7e6   : > { %v2030_v54 = vpop.f32.mrf.mxu1  ;;  %2059 = vmatpush1.bf16.msra.mxu0 %v2039_v21 }
 0x7e7   : > { %2583 = vmatprep.subr.mxu0 %v2341_v14 }
 0x7e9   : > { %2568 = vmatmul.mubr.msk.bf16.vlgmr.msra.gmra.mxu0 %vm921_vm10, %v2032_v23 }
 0x7ea   : > { %2584 = vmatpush3.msra.mxu0 %v2325_v18 }
 0x7eb   : > { %2585 = vmatprep.subr.mxu0 %v2340_v27 }
 0x7ec   : > { %2586 = vmatpush3.msra.mxu0 %v2324_v52 }
 0x7ed   : > { %2587 = vmatprep.subr.mxu0 %v2339_v34 }
 0x7ee   : > { %2588 = vmatpush3.msra.mxu0 %v2323_v24 }
 0x7ef   : > { %2589 = vmatprep.subr.mxu0 %v2338_v19 }
 0x7f0   : > { %2590 = vmatpush3.msra.mxu0 %v2322_v3 }
 0x7f1   : > { %2591 = vmatprep.subr.mxu0 %v2337_v49 }
 0x7f2   : > { %2592 = vmatpush3.msra.mxu0 %v2321_v57 }
 0x7f3   : > { %2593 = vmatprep.subr.mxu0 %v2336_v36 }
 0x7f4   : > { %2594 = vmatpush3.msra.mxu0 %v2320_v16  ;;  %v2570_v16 = vld [vmem:[%s4225_s2 + $0x2] ss:$8 sm:$0x3] }
 0x7f5   : > { %2595 = vmatprep.subr.mxu0 %v2335_v15  ;;  %v2571_v15 = vld [vmem:[%s4225_s2 + $0x3] ss:$8 sm:$0x3] }
 0x7f6   : > { %2596 = vmatpush3.msra.mxu0 %v2319_v60 }
 0x7f7   : > { %2597 = vmatprep.subr.mxu0 %v2334_v17 }
 0x7f8   : > { %2598 = vmatpush3.msra.mxu0 %v2318_v9 }
 0x7f9   : > { %2599 = vmatprep.subr.mxu0 %v2333_v63 }
 0x7fa   : > { %2600 = vmatpush3.msra.mxu0 %v2317_v38  ;;  %v2141_v38 = vrot.slane %v2570_v16, %v4367_v13 }
 0x7fb   : > { %2601 = vmatprep.subr.mxu0 %v2332_v47  ;;  %v2145_v47 = vrot.slane %v2570_v16, %v4368_v41 }
 0x7fc   : > { %2602 = vmatpush3.msra.mxu0 %v2316_v10  ;;  %v2161_v10 = vrot.slane %v2571_v15, %v4367_v13 }
 0x7fd   : > { %2603 = vmatprep.subr.mxu0 %v2331_v25  ;;  %v2165_v25 = vrot.slane %v2571_v15, %v4368_v41 }
 0x7fe   : > { %2604 = vmatpush3.msra.mxu0 %v2315_v61 }
 0x7ff   : > { %2605 = vmatprep.subr.mxu0 %v2330_v35 }
 0x800   : > { %2606 = vmatpush3.msra.mxu0 %v2314_v31 }
 0x801   : > { %2607 = vmatprep.subr.mxu0 %v2329_v20 }
 0x802   : > { %2608 = vmatpush3.msra.mxu0 %v2313_v7 }
 0x803   : > { %2609 = vmatprep.subr.mxu0 %v2328_v4 }
 0x804   : > { %2610 = vmatpush3.msra.mxu0 %v2312_v59 }
 0x8a9   : > { %v2078_v45 = vpop.f32.mrf.mxu0 }
 0x8aa   : > { %v3997_v0 = vadd.f32 %v2078_v45, %v4364_v44  ;;  %v2181_v44 = vrot.slane %v2572_v51, %v4367_v13 }
 0x8ab   : > { %v2080_v62 = vpop.f32.mrf.mxu0 }
 0x8ac   : > { %2087 = vst [vmem:[%s521_s29] sm:$0xff] %v3997_v0  ;;  %v4001_v5 = vadd.f32 %v2080_v62, %v4365_v6  ;;  %2210 = vrot.lane.b32.xlu0 %v3997_v0, %s2883_s25  ;;  %2230 = vrot.lane.b32.xlu1 %v3997_v0, %s2882_s24 }
 0x8ad   : > { %v2082_v33 = vpop.f32.mrf.mxu0 }
 0x8ae   : > { %2088 = vst [vmem:[%s521_s29 + $0x8] sm:$0xff] %v4001_v5 }
 0x8af   : > { %v2083_v40 = vpop.f32.mrf.mxu0 }
 0x8b0   : > { %2170 = vrot.lane.b32.xlu0 %v3997_v0, %s2885_s27  ;;  %2190 = vrot.lane.b32.xlu1 %v3997_v0, %s2884_s26  ;;  %v2185_v40 = vrot.slane %v2572_v51, %v4368_v41 }
 0x8b4   : > { %2192 = vrot.lane.b32.xlu1 %v4001_v5, %s2884_s26  ;;  %2232 = vrot.lane.b32.xlu0 %v4001_v5, %s2882_s24 }
 0x8b8   : > { %2212 = vrot.lane.b32.xlu1 %v4001_v5, %s2883_s25  ;;  %2130 = vrot.lane.b32.xlu0 %v3997_v0, %s4366_s17 }
 0x8bc   : > { %2172 = vrot.lane.b32.xlu1 %v4001_v5, %s2885_s27  ;;  %2150 = vrot.lane.b32.xlu0 %v3997_v0, %s4286_s30 }
 0x8c0   : > { %2132 = vrot.lane.b32.xlu1 %v4001_v5, %s4366_s17  ;;  %2090 = vrot.lane.b32.xlu0 %v3997_v0, %s4287_s23 }
 0x8c4   : > { %2152 = vrot.lane.b32.xlu1 %v4001_v5, %s4286_s30  ;;  %2110 = vrot.lane.b32.xlu0 %v3997_v0, %s4288_s28 }
 0x8c8   : > { %2092 = vrot.lane.b32.xlu1 %v4001_v5, %s4287_s23  ;;  %2345 = vperm.xlu0 %2676, %v2342_v58  }
 0x8cc   : > { %2112 = vrot.lane.b32.xlu1 %v4001_v5, %s4288_s28  ;;  %s525_s28 = scalar_lea.vmem %s4238_s15, %s4370_s20 }
 0x91e   : > { %v2211_v48 = vpop.permute.xlu0 %2210  ;;  %v2231_v8 = vpop.permute.xlu1 %2230 }
 0x922   : > { %v2171_v37 = vpop.permute.xlu0 %2170  ;;  %v2191_v39 = vpop.permute.xlu1 %2190 }
 0x926   : > { %v2193_v22 = vpop.permute.xlu1 %2192  ;;  %v2233_v50 = vpop.permute.xlu0 %2232 }
 0x927   : > { %v2234_v55 = vsel %vm690_vm0, %v2231_v8, %v2233_v50  ;;  %v2235_v11 = vsel %vm690_vm0, %v2233_v50, %v2231_v8  ;;  %v2194_v42 = vsel %vm646_vm1, %v2191_v39, %v2193_v22  ;;  %v2195_v21 = vsel %vm646_vm1, %v2193_v22, %v2191_v39  ;;  %v2096_v8 = vld [vmem:[%s4225_s2] ss:$8 sm:$0x3] }
 0x928   : > { %v2248_v26 = vmul.f32 %v2241_v43, %v2234_v55  ;;  %v2249_v46 = vmul.f32 %v2245_v2, %v2235_v11  ;;  %v2208_v62 = vmul.f32 %v2201_v12, %v2194_v42  ;;  %v2209_v58 = vmul.f32 %v2205_v53, %v2195_v21  ;;  %v2327_v21 = vld [vmem:[%s4226_s3 + $0x88] sm:$0xff] }
 0x929   : > { %v2101_v43 = vrot.slane %v2096_v8, %v4367_v13  ;;  %v2105_v2 = vrot.slane %v2096_v8, %v4368_v41  ;;  %v2125_v12 = vrot.slane %v2569_v32, %v4368_v41  ;;  %2611 = vmatprep.subr.mxu0 %v2327_v21 }
 0x92a   : > { %v2258_v54 = vpack.c.bf16 %v2248_v26, %v2248_v26  ;;  %v2259_v23 = vpack.c.bf16 %v2249_v46, %v2249_v46  ;;  %v2213_v45 = vpop.permute.xlu1 %2212  ;;  %v2131_v27 = vpop.permute.xlu0 %2130  ;;  %2612 = vmatpush3.msra.mxu0 %v2311_v30 }
 0x92b   : > { %v2214_v6 = vsel %vm668_vm2, %v2211_v48, %v2213_v45  ;;  %v2215_v33 = vsel %vm668_vm2, %v2213_v45, %v2211_v48 }
 0x92c   : > { %v2228_v14 = vmul.f32 %v2221_v28, %v2214_v6  ;;  %v2229_v18 = vmul.f32 %v2225_v56, %v2215_v33  ;;  %2576 = vmatprep.subr.msk.bf16.mxu1 %vm728_vm3, %v2259_v23  ;;  %v2264_v52 = vsel %vm728_vm3, %v2258_v54, 0  ;;  %v2089_v56 = vld [vmem:[%s4235_s12] sm:$0xf] }
 0x92d   : > { %2276 = vmatpush1.bf16.msra.mxu1 %v2264_v52  ;;  %v2326_v54 = vld [vmem:[%s4226_s3 + $0x80] sm:$0xff] }
 0x92e   : > { %v2256_v34 = vpack.c.bf16 %v2228_v14, %v2208_v62  ;;  %v2173_v24 = vpop.permute.xlu1 %2172  ;;  %v2257_v19 = vpack.c.bf16 %v2229_v18, %v2209_v58  ;;  %v2151_v17 = vpop.permute.xlu0 %2150  ;;  %v2310_v23 = vld [vmem:[%s4226_s3] sm:$0xff]  ;;  %2613 = vmatprep.subr.mxu0 %v2326_v54 }
 0x92f   : > { %v2174_v3 = vsel %vm624_vm4, %v2171_v37, %v2173_v24  ;;  %v2175_v49 = vsel %vm624_vm4, %v2173_v24, %v2171_v37  ;;  %2614 = vmatpush3.msra.mxu0 %v2310_v23 }
 0x930   : > { %v2188_v57 = vmul.f32 %v2181_v44, %v2174_v3  ;;  %v2189_v36 = vmul.f32 %v2185_v40, %v2175_v49  ;;  %2277 = vmatprep.subr.bf16.mxu1 %v2257_v19 }
 0x931   : > { %2278 = vmatpush1.bf16.msra.mxu1 %v2256_v34 }
 0x932   : > { %v2254_v60 = vpack.c.bf16 %v2188_v57, %v3997_v0  ;;  %v2133_v9 = vpop.permute.xlu1 %2132  ;;  %v2255_v63 = vpack.c.bf16 %v2189_v36, %v4001_v5  ;;  %v2091_v4 = vpop.permute.xlu0 %2090 }
 0x933   : > { %v2134_v61 = vsel %vm580_vm5, %v2131_v27, %v2133_v9  ;;  %v2135_v35 = vsel %vm580_vm5, %v2133_v9, %v2131_v27 }
 0x934   : > { %2279 = vmatprep.subr.bf16.mxu1 %v2255_v63  ;;  %v2148_v20 = vmul.f32 %v2141_v38, %v2135_v35  ;;  %v2149_v7 = vmul.f32 %v2145_v47, %v2134_v61 }
 0x935   : > { %2280 = vmatpush1.bf16.msra.mxu1 %v2254_v60 }
 0x936   : > { %v2153_v0 = vpop.permute.xlu1 %2152  ;;  %v2111_v53 = vpop.permute.xlu0 %2110 }
 0x937   : > { %v2154_v5 = vsel %vm602_vm6, %v2151_v17, %v2153_v0  ;;  %v2155_v31 = vsel %vm602_vm6, %v2153_v0, %v2151_v17 }
 0x938   : > { %v2168_v59 = vmul.f32 %v2161_v10, %v2155_v31  ;;  %v2169_v48 = vmul.f32 %v2165_v25, %v2154_v5 }
 0x93a   : > { %v2252_v37 = vpack.c.bf16 %v2168_v59, %v2148_v20  ;;  %v2093_v39 = vpop.permute.xlu1 %2092  ;;  %v2253_v1 = vpack.c.bf16 %v2169_v48, %v2149_v7 }
 0x93b   : > { %v2094_v22 = vsel %vm537_vm7, %v2091_v4, %v2093_v39  ;;  %v2095_v50 = vsel %vm537_vm7, %v2093_v39, %v2091_v4 }
 0x93c   : > { %2281 = vmatprep.subr.bf16.mxu1 %v2253_v1  ;;  %v2108_v51 = vmul.f32 %v2101_v43, %v2095_v50  ;;  %v2109_v42 = vmul.f32 %v2105_v2, %v2094_v22 }
 0x93d   : > { %2282 = vmatpush1.bf16.msra.mxu1 %v2252_v37 }
 0x93e   : > { %v2113_v55 = vpop.permute.xlu1 %2112 }
 0x93f   : > { %v2114_v11 = vsel %vm558_vm8, %v2111_v53, %v2113_v55  ;;  %v2115_v28 = vsel %vm558_vm8, %v2113_v55, %v2111_v53 }
 0x940   : > { %v2128_v13 = vmul.f32 %v2121_v29, %v2115_v28  ;;  %v2129_v26 = vmul.f32 %v2125_v12, %v2114_v11 }
 0x942   : > { %v2250_v41 = vpack.c.bf16 %v2128_v13, %v2108_v51  ;;  %v2251_v46 = vpack.c.bf16 %v2129_v26, %v2109_v42 }
 0x943   : > { %v2346_v14 = vpop.permute.xlu0 %2345 }
 0x944   : > { %2283 = vmatprep.subr.bf16.mxu1 %v2251_v46 }
 0x945   : > { %2284 = vmatpush1.bf16.msra.mxu1 %v2250_v41 }
 0x948   : > { %2577 = vmatmul.mubr.msk.bf16.vlgmr.msra.gmra.mxu1 %vm724_vm9, %v2089_v56 }
 0xa08   : > { %v2303_v45 = vpop.f32.mrf.mxu1 }
 0xa0a   : > { %v2305_v44 = vpop.f32.mrf.mxu1 }
 0xa0b   : > { %2412 = vmatprep.mubr.f32.mxu0 %v2305_v44 }
 0xa0c   : > { %2413 = vmatmul.mubr.f32.vlgmr.msra.gmra.mxu0 %v2303_v45  ;;  %v2307_v62 = vpop.f32.mrf.mxu1 }
 0xa0e   : > { %v2308_v6 = vpop.f32.mrf.mxu1 }
 0xacc   : > { %v2615_v33 = vpop.f32.mrf.mxu0 }
 0xace   : > { %v2616_v40 = vpop.f32.mrf.mxu0 }
 0xacf   : > { %v2617_v58 = vadd.f32 %v2616_v40, %v2615_v33 }
 0xad1   : > { %v2415_v18 = vadd.f32 %v2617_v58, %v2346_v14 }
 0xad3   : > { %2419 = vst.msk [vmem:[%s525_s28] sm:$0xff] %vm2418_vm11, %v2415_v18 }
 0xad4 PF: > { %s26_s18 = sadd.s32 1, %s2880_s18  }
 0xad5   : > { %p23_p4 = scmp.ge.s32.totalorder %s26_s18, 4  }
 0xad7   :  { %25 = sbr.rel (!%p23_p4) target bundleno = 1 (0x1), region = 128 }

</bundles_post_ra>
